<compile_context>
chip_gen: v6e
topology: v6e:2x2x1
jax: 0.10.0
libtpu: 0.0.40
codegen_flags: <defaults>
</compile_context>

<pallas_src>
import functools
import math

import jax
import jax.numpy as jnp
from jax.experimental import pallas as pl
from jax.experimental.pallas import tpu as pltpu


# ----------------------------- Pallas helpers -----------------------------

def _mm(a, b):
    # bf16 MXU operands, f32 accumulation. Weight refs are already stored bf16
    # (astype is a traced no-op for them); only activations actually cast.
    return jnp.dot(a.astype(jnp.bfloat16), b.astype(jnp.bfloat16),
                   preferred_element_type=jnp.float32)


# ------------------------------ fused kernel ------------------------------

def fused_pred_kernel(x_ref, adj_ref, gidr_ref, gidc_ref,
                      gnn_w_ref, gnn_b_ref,
                      wq_ref, wk_ref, wv_ref, wo_ref,
                      w1_ref, b1_ref, w2_ref, b2_ref,
                      g1_ref, be1_ref, g2_ref, be2_ref,
                      mw1_ref, mb1_ref, mw2_ref, mb2_ref, mw3_ref, mb3_ref,
                      o_ref, attn_sc,
                      *, layer_num, heads, num_tasks, num_graphs,
                      e_real, h_real, slope):
    _, n, ep = x_ref.shape
    hdp = ep // heads                    # padded per-head lane slot width
    hd_real = e_real // heads            # real per-head width
    scale = 1.0 / math.sqrt(float(hd_real))
    inv_e = 1.0 / float(e_real)

    # lane-validity mask over padded embed dim (hoisted, built once)
    lane = jax.lax.broadcasted_iota(jnp.int32, (1, ep), 1)
    lmask = (lane < e_real).astype(jnp.float32)

    x = x_ref[0]                                              # [N, EP] f32
    adj = adj_ref[0]                                          # [N, N] bf16
    gid_row = gidr_ref[0]                                     # [1, N] int32
    gid_col = gidc_ref[0]                                     # [N, 1] int32

    # ---- GeoGNN message-passing layers (atom-bond branch) ----
    for l in range(layer_num):                                # static loop
        agg = jnp.dot(adj, x.astype(jnp.bfloat16),
                      preferred_element_type=jnp.float32)
        h = _mm((x + agg)[:, :e_real], gnn_w_ref[l]) + gnn_b_ref[l]
        if l != layer_num - 1:                                # last_act=False
            h = jnp.maximum(h, 0.0)
        x = h + x                                             # residual

    # ---- transformer encoder layer (MHA + FFN + layernorms) ----
    xr = x[:, :e_real]                                        # real lanes only
    q = _mm(xr, wq_ref[...])                                  # head-slot layout
    k = _mm(xr, wk_ref[...])
    v = _mm(xr, wv_ref[...])

    # block-diagonal attention mask built in-kernel from per-node graph ids
    same = (jnp.broadcast_to(gid_col, (n, n)) ==
            jnp.broadcast_to(gid_row, (n, n)))
    bias = jnp.where(same, 0.0, -1e9).astype(jnp.float32)     # [N, N]

    for hh in range(heads):                                   # static, 4 iters
        lo = hh * hdp
        qh, kh, vh = q[:, lo:lo + hdp], k[:, lo:lo + hdp], v[:, lo:lo + hdp]
        s = jax.lax.dot_general(
            qh.astype(jnp.bfloat16), kh.astype(jnp.bfloat16),
            (((1,), (1,)), ((), ())),
            preferred_element_type=jnp.float32) * scale + bias
        s = s - jnp.max(s, axis=-1, keepdims=True)
        p = jnp.exp(s)
        p = p * pl.reciprocal(jnp.sum(p, axis=-1, keepdims=True), approx=True)
        attn_sc[:, lo:lo + hdp] = _mm(p, vh)                  # head slot write
    attn = _mm(attn_sc[...], wo_ref[...])                     # single out-proj

    def masked_ln(h, g, be):
        mu = jnp.sum(h, axis=-1, keepdims=True) * inv_e
        d = (h - mu) * lmask
        var = jnp.sum(d * d, axis=-1, keepdims=True) * inv_e
        return d * jax.lax.rsqrt(var + 1e-5) * g + be

    h1 = masked_ln(x + attn, g1_ref[...], be1_ref[...])
    f = jnp.maximum(_mm(h1[:, :e_real], w1_ref[...]) + b1_ref[...], 0.0)
    f = _mm(f[:, :e_real], w2_ref[...]) + b2_ref[...]
    h2 = masked_ln(h1 + f, g2_ref[...], be2_ref[...])

    # ---- readout: global_mean_pool (segment matrix built from graph ids) ----
    bidx = jax.lax.broadcasted_iota(jnp.int32, (num_graphs, n), 0)
    seg = (bidx == jnp.broadcast_to(gid_row, (num_graphs, n))).astype(jnp.float32)
    summed = _mm(seg, h2)                                     # [B, EP]
    counts = jnp.sum(seg, axis=-1, keepdims=True)
    g_repr = summed / jnp.maximum(counts, 1.0)                # exact division
    gr = g_repr[:, :e_real]                                   # [B, e_real]

    # ---- per-task MLP heads: Linear->LeakyReLU->Linear->LeakyReLU->Linear ----
    # final weights pre-scattered so task t writes only output column t;
    # sum of contributions gives one lane-contiguous [B, T] store.
    y = jnp.zeros((num_graphs, num_tasks), jnp.float32)
    for t in range(num_tasks):                                # static loop
        a = _mm(gr, mw1_ref[t]) + mb1_ref[t]
        a = jnp.where(a > 0, a, slope * a)
        a = _mm(a[:, :h_real], mw2_ref[t]) + mb2_ref[t]
        a = jnp.where(a > 0, a, slope * a)
        y = y + _mm(a[:, :h_real], mw3_ref[t]) + mb3_ref[t]   # [B, T]
    o_ref[0] = y


# ----------------------------- model wrapper ------------------------------

PER_STEP = ("x", "adj", "gidr", "gidc")
WEIGHTS = ("gnn_w", "gnn_b", "wq", "wk", "wv", "wo",
           "w1", "b1", "w2", "b2", "g1", "be1", "g2", "be2",
           "mw1", "mb1", "mw2", "mb2", "mw3", "mb3")


def pred_model_forward(pp, *, layer_num, heads, num_tasks, num_graphs,
                       e_real, h_real):
    names = PER_STEP + WEIGHTS
    inputs = [pp[name] for name in names]
    nb, n, ep = pp["x"].shape

    in_specs = []
    for name in names:
        a = pp[name]
        nd = a.ndim
        if name in PER_STEP:
            # per-batch tensors: new block per grid step (pipelined)
            in_specs.append(pl.BlockSpec(
                (1,) + a.shape[1:],
                lambda i, _nd=nd: (i,) + (0,) * (_nd - 1)))
        else:
            # weights: constant block index -> fetched once, VMEM-resident
            in_specs.append(pl.BlockSpec(
                a.shape, lambda i, _nd=nd: (0,) * _nd))

    kernel = functools.partial(fused_pred_kernel, layer_num=layer_num,
                               heads=heads, num_tasks=num_tasks,
                               num_graphs=num_graphs, e_real=e_real,
                               h_real=h_real, slope=0.01)
    out = pl.pallas_call(
        kernel,
        grid=(nb,),
        in_specs=in_specs,
        out_specs=pl.BlockSpec((1, num_graphs, num_tasks),
                               lambda i: (i, 0, 0)),
        out_shape=jax.ShapeDtypeStruct((nb, num_graphs, num_tasks),
                                       jnp.float32),
        scratch_shapes=[pltpu.VMEM((n, ep), jnp.float32)],
        compiler_params=pltpu.CompilerParams(
            dimension_semantics=("parallel",),     # v7x: split batches on 2 TCs
            vmem_limit_bytes=4 * 1024 * 1024),
    )(*inputs)
    # per batch: torch.stack(task outputs).squeeze() -> [T, B]
    y_pred = jnp.transpose(out, (0, 2, 1))         # [NB, T, B]
    loss_pe = None
    return y_pred, loss_pe


# ------------------------- parameter construction -------------------------

def glorot(key, shape):
    fan_in, fan_out = shape[-2], shape[-1]
    limit = (6.0 / (fan_in + fan_out)) ** 0.5
    return jax.random.uniform(key, shape, jnp.float32, -limit, limit)


def init_real_params(key, e, h, layer_num, num_tasks):
    keys = iter(jax.random.split(key, 64))
    p = {}
    p["gnn_w"] = jnp.stack([glorot(next(keys), (e, e)) for _ in range(layer_num)])
    p["gnn_b"] = jnp.zeros((layer_num, 1, e), jnp.float32)
    for name in ("wq", "wk", "wv", "wo", "w1", "w2"):
        p[f"tf_{name}"] = glorot(next(keys), (e, e))
    p["tf_b1"] = jnp.zeros((1, e), jnp.float32)
    p["tf_b2"] = jnp.zeros((1, e), jnp.float32)
    p["tf_g1"] = jnp.ones((1, e), jnp.float32)
    p["tf_be1"] = jnp.zeros((1, e), jnp.float32)
    p["tf_g2"] = jnp.ones((1, e), jnp.float32)
    p["tf_be2"] = jnp.zeros((1, e), jnp.float32)
    p["mlp_w1"] = jnp.stack([glorot(next(keys), (e, h)) for _ in range(num_tasks)])
    p["mlp_b1"] = jnp.zeros((num_tasks, 1, h), jnp.float32)
    p["mlp_w2"] = jnp.stack([glorot(next(keys), (h, h)) for _ in range(num_tasks)])
    p["mlp_b2"] = jnp.zeros((num_tasks, 1, h), jnp.float32)
    p["mlp_w3"] = jnp.stack([glorot(next(keys), (h, 1)) for _ in range(num_tasks)])
    p["mlp_b3"] = jnp.zeros((num_tasks, 1, 1), jnp.float32)
    return p


def _pad_to(x, shape):
    out = jnp.zeros(shape, jnp.float32)
    return out.at[tuple(slice(0, s) for s in x.shape)].set(x)


def _head_slot_cols(w, ep, heads, hd):
    """[E,E] -> [E, EP]: head-h output cols mapped to padded lane slot h*(EP//heads)
    (contraction rows kept at the real width E)."""
    e_in = w.shape[0]
    hdp = ep // heads
    out = jnp.zeros((e_in, ep), jnp.float32)
    for h in range(heads):
        out = out.at[:, h * hdp:h * hdp + hd].set(w[:, h * hd:(h + 1) * hd])
    return out


def _head_slot_rows(w, ep, heads, hd):
    """[E,E] (concat-head rows) -> [EP,EP] with head-h rows placed in slot h."""
    _, e_out = w.shape
    hdp = ep // heads
    out = jnp.zeros((ep, ep), jnp.float32)
    for h in range(heads):
        out = out.at[h * hdp:h * hdp + hd, :e_out].set(w[h * hd:(h + 1) * hd, :])
    return out


def build_inputs(params, x_nodes, adj, batch_list, *,
                 ep, hp, heads, e_real, h_real):
    nb, n, _ = x_nodes.shape
    L = params["gnn_w"].shape[0]
    T = params["mlp_w1"].shape[0]
    hd = e_real // heads
    bf16 = jnp.bfloat16
    pp = {}
    pp["x"] = _pad_to(x_nodes, (nb, n, ep))
    pp["adj"] = adj.astype(bf16)                               # 0/1, exact bf16
    pp["gidr"] = batch_list.astype(jnp.int32)[:, None, :]      # [NB, 1, N]
    pp["gidc"] = batch_list.astype(jnp.int32)[:, :, None]      # [NB, N, 1]
    pp["gnn_w"] = _pad_to(params["gnn_w"], (L, e_real, ep)).astype(bf16)
    pp["gnn_b"] = _pad_to(params["gnn_b"], (L, 1, ep))
    pp["wq"] = _head_slot_cols(params["tf_wq"], ep, heads, hd).astype(bf16)
    pp["wk"] = _head_slot_cols(params["tf_wk"], ep, heads, hd).astype(bf16)
    pp["wv"] = _head_slot_cols(params["tf_wv"], ep, heads, hd).astype(bf16)
    pp["wo"] = _head_slot_rows(params["tf_wo"], ep, heads, hd).astype(bf16)
    pp["w1"] = _pad_to(params["tf_w1"], (e_real, ep)).astype(bf16)
    pp["b1"] = _pad_to(params["tf_b1"], (1, ep))
    pp["w2"] = _pad_to(params["tf_w2"], (e_real, ep)).astype(bf16)
    pp["b2"] = _pad_to(params["tf_b2"], (1, ep))
    pp["g1"] = _pad_to(params["tf_g1"], (1, ep))
    pp["be1"] = _pad_to(params["tf_be1"], (1, ep))
    pp["g2"] = _pad_to(params["tf_g2"], (1, ep))
    pp["be2"] = _pad_to(params["tf_be2"], (1, ep))
    pp["mw1"] = _pad_to(params["mlp_w1"], (T, e_real, hp)).astype(bf16)
    pp["mb1"] = _pad_to(params["mlp_b1"], (T, 1, hp))
    pp["mw2"] = _pad_to(params["mlp_w2"], (T, h_real, hp)).astype(bf16)
    pp["mb2"] = _pad_to(params["mlp_b2"], (T, 1, hp))
    # final layer: scatter task t's [H,1] weight/bias into output column t so
    # the kernel accumulates a lane-contiguous [B, T] result (tiny -> keep f32).
    mw3 = jnp.zeros((T, h_real, T), jnp.float32)
    mb3 = jnp.zeros((T, 1, T), jnp.float32)
    for t in range(T):
        mw3 = mw3.at[t, :, t].set(params["mlp_w3"][t, :, 0])
        mb3 = mb3.at[t, 0, t].set(params["mlp_b3"][t, 0, 0])
    pp["mw3"] = mw3
    pp["mb3"] = mb3

    # Padding invariant required by the masked LayerNorm / sliced contractions:
    # every column beyond the real width must be exactly zero.
    for name, lim in (("gnn_w", e_real), ("gnn_b", e_real), ("wo", e_real),
                      ("w1", e_real), ("b1", e_real), ("w2", e_real),
                      ("b2", e_real), ("g1", e_real), ("be1", e_real),
                      ("g2", e_real), ("be2", e_real),
                      ("mw1", h_real), ("mb1", h_real),
                      ("mw2", h_real), ("mb2", h_real)):
        tail = pp[name][..., lim:].astype(jnp.float32)
        assert float(jnp.max(jnp.abs(tail))) == 0.0, f"padding leak in {name}"
    return pp


# ----------------------------------- main ----------------------------------

if __name__ == "__main__":
    EMBED_DIM = 32
    HIDDEN_DIM = 32
    EMBED_PAD = 128           # lane-dense padded embed dim
    HIDDEN_PAD = 128          # lane-dense padded MLP hidden dim
    LAYER_NUM = 2
    HEADS = 4
    NUM_TASKS = 2
    NUM_BATCHES = 2           # grid axis: independent graph-batches
    NUM_GRAPHS = 2            # graphs per batch
    NODES_PER_GRAPH = 8
    N = NUM_GRAPHS * NODES_PER_GRAPH

    root = jax.random.PRNGKey(0)
    k_param, k_feat = jax.random.split(root)

    params = init_real_params(k_param, EMBED_DIM, HIDDEN_DIM, LAYER_NUM, NUM_TASKS)

    # deterministic synthetic graph batches
    x_nodes = jax.random.normal(k_feat, (NUM_BATCHES, N, EMBED_DIM), jnp.float32)

    rows, cols = [], []
    for g in range(NUM_GRAPHS):               # ring graph per molecule
        for i in range(NODES_PER_GRAPH):
            a = g * NODES_PER_GRAPH + i
            c = g * NODES_PER_GRAPH + (i + 1) % NODES_PER_GRAPH
            rows += [a, c]
            cols += [c, a]
    adj1 = jnp.zeros((N, N), jnp.float32).at[jnp.array(rows), jnp.array(cols)].set(1.0)
    adj = jnp.broadcast_to(adj1[None], (NUM_BATCHES, N, N))

    batch_list1 = jnp.repeat(jnp.arange(NUM_GRAPHS), NODES_PER_GRAPH)
    batch_list = jnp.broadcast_to(batch_list1[None], (NUM_BATCHES, N))

    pp = build_inputs(params, x_nodes, adj, batch_list,
                      ep=EMBED_PAD, hp=HIDDEN_PAD, heads=HEADS,
                      e_real=EMBED_DIM, h_real=HIDDEN_DIM)

    y_pred, loss_pe = pred_model_forward(
        pp, layer_num=LAYER_NUM, heads=HEADS, num_tasks=NUM_TASKS,
        num_graphs=NUM_GRAPHS, e_real=EMBED_DIM, h_real=HIDDEN_DIM)
    y_pred = jax.block_until_ready(y_pred)

    assert y_pred.shape == (NUM_BATCHES, NUM_TASKS, NUM_GRAPHS)
    assert bool(jnp.all(jnp.isfinite(y_pred)))
    print("KERNEL_OK")
</pallas_src>

<mosaic_0001>
module attributes {stable_mosaic.version = 11 : i64} {
  func.func @fused_pred_kernel(%arg0: i32, %arg1: memref<1x16x128xf32, #tpu.memory_space<vmem>>, %arg2: memref<1x16x16xbf16, #tpu.memory_space<vmem>>, %arg3: memref<1x1x16xi32, #tpu.memory_space<vmem>>, %arg4: memref<1x16x1xi32, #tpu.memory_space<vmem>>, %arg5: memref<2x32x128xbf16, #tpu.memory_space<vmem>>, %arg6: memref<2x1x128xf32, #tpu.memory_space<vmem>>, %arg7: memref<32x128xbf16, #tpu.memory_space<vmem>>, %arg8: memref<32x128xbf16, #tpu.memory_space<vmem>>, %arg9: memref<32x128xbf16, #tpu.memory_space<vmem>>, %arg10: memref<128x128xbf16, #tpu.memory_space<vmem>>, %arg11: memref<32x128xbf16, #tpu.memory_space<vmem>>, %arg12: memref<1x128xf32, #tpu.memory_space<vmem>>, %arg13: memref<32x128xbf16, #tpu.memory_space<vmem>>, %arg14: memref<1x128xf32, #tpu.memory_space<vmem>>, %arg15: memref<1x128xf32, #tpu.memory_space<vmem>>, %arg16: memref<1x128xf32, #tpu.memory_space<vmem>>, %arg17: memref<1x128xf32, #tpu.memory_space<vmem>>, %arg18: memref<1x128xf32, #tpu.memory_space<vmem>>, %arg19: memref<2x32x128xbf16, #tpu.memory_space<vmem>>, %arg20: memref<2x1x128xf32, #tpu.memory_space<vmem>>, %arg21: memref<2x32x128xbf16, #tpu.memory_space<vmem>>, %arg22: memref<2x1x128xf32, #tpu.memory_space<vmem>>, %arg23: memref<2x32x2xf32, #tpu.memory_space<vmem>>, %arg24: memref<2x1x2xf32, #tpu.memory_space<vmem>>, %arg25: memref<1x2x2xf32, #tpu.memory_space<vmem>>, %arg26: memref<16x128xf32, #tpu.memory_space<vmem>>) attributes {dimension_semantics = [#tpu.dimension_semantics<parallel>], iteration_bounds = array<i64: 2>, scalar_prefetch = 0 : i64, scratch_operands = 1 : i64, tpu.core_type = #tpu.core_type<tc>, window_params = [{transform_indices = @transform_0, window_bounds = array<i64: 1, 16, 128>}, {transform_indices = @transform_1, window_bounds = array<i64: 1, 16, 16>}, {transform_indices = @transform_2, window_bounds = array<i64: 1, 1, 16>}, {transform_indices = @transform_3, window_bounds = array<i64: 1, 16, 1>}, {pipeline_mode = #tpu.pipeline_mode<synchronous>, transform_indices = @transform_4, window_bounds = array<i64: 2, 32, 128>}, {pipeline_mode = #tpu.pipeline_mode<synchronous>, transform_indices = @transform_5, window_bounds = array<i64: 2, 1, 128>}, {pipeline_mode = #tpu.pipeline_mode<synchronous>, transform_indices = @transform_6, window_bounds = array<i64: 32, 128>}, {pipeline_mode = #tpu.pipeline_mode<synchronous>, transform_indices = @transform_7, window_bounds = array<i64: 32, 128>}, {pipeline_mode = #tpu.pipeline_mode<synchronous>, transform_indices = @transform_8, window_bounds = array<i64: 32, 128>}, {pipeline_mode = #tpu.pipeline_mode<synchronous>, transform_indices = @transform_9, window_bounds = array<i64: 128, 128>}, {pipeline_mode = #tpu.pipeline_mode<synchronous>, transform_indices = @transform_10, window_bounds = array<i64: 32, 128>}, {pipeline_mode = #tpu.pipeline_mode<synchronous>, transform_indices = @transform_11, window_bounds = array<i64: 1, 128>}, {pipeline_mode = #tpu.pipeline_mode<synchronous>, transform_indices = @transform_12, window_bounds = array<i64: 32, 128>}, {pipeline_mode = #tpu.pipeline_mode<synchronous>, transform_indices = @transform_13, window_bounds = array<i64: 1, 128>}, {pipeline_mode = #tpu.pipeline_mode<synchronous>, transform_indices = @transform_14, window_bounds = array<i64: 1, 128>}, {pipeline_mode = #tpu.pipeline_mode<synchronous>, transform_indices = @transform_15, window_bounds = array<i64: 1, 128>}, {pipeline_mode = #tpu.pipeline_mode<synchronous>, transform_indices = @transform_16, window_bounds = array<i64: 1, 128>}, {pipeline_mode = #tpu.pipeline_mode<synchronous>, transform_indices = @transform_17, window_bounds = array<i64: 1, 128>}, {pipeline_mode = #tpu.pipeline_mode<synchronous>, transform_indices = @transform_18, window_bounds = array<i64: 2, 32, 128>}, {pipeline_mode = #tpu.pipeline_mode<synchronous>, transform_indices = @transform_19, window_bounds = array<i64: 2, 1, 128>}, {pipeline_mode = #tpu.pipeline_mode<synchronous>, transform_indices = @transform_20, window_bounds = array<i64: 2, 32, 128>}, {pipeline_mode = #tpu.pipeline_mode<synchronous>, transform_indices = @transform_21, window_bounds = array<i64: 2, 1, 128>}, {pipeline_mode = #tpu.pipeline_mode<synchronous>, transform_indices = @transform_22, window_bounds = array<i64: 2, 32, 2>}, {pipeline_mode = #tpu.pipeline_mode<synchronous>, transform_indices = @transform_23, window_bounds = array<i64: 2, 1, 2>}, {transform_indices = @transform_24, window_bounds = array<i64: 1, 2, 2>}]} {
    %0 = tpu.iota {dimensions = array<i32: 1>} : vector<1x128xi32>
    %c32_i32 = arith.constant 32 : i32
    %1 = vector.broadcast %c32_i32 : i32 to vector<1x128xi32>
    %2 = arith.cmpi slt, %0, %1 : vector<1x128xi32>
    %3 = arith.extui %2 : vector<1x128xi1> to vector<1x128xi32>
    %4 = arith.sitofp %3 : vector<1x128xi32> to vector<1x128xf32>
    %c0 = arith.constant 0 : index
    %c0_0 = arith.constant 0 : index
    %c0_1 = arith.constant 0 : index
    %5 = vector.load %arg1[%c0, %c0_0, %c0_1] : memref<1x16x128xf32, #tpu.memory_space<vmem>>, vector<1x16x128xf32>
    %6 = vector.shape_cast %5 : vector<1x16x128xf32> to vector<16x128xf32>
    %c0_2 = arith.constant 0 : index
    %c0_3 = arith.constant 0 : index
    %c0_4 = arith.constant 0 : index
    %7 = vector.load %arg2[%c0_2, %c0_3, %c0_4] : memref<1x16x16xbf16, #tpu.memory_space<vmem>>, vector<1x16x16xbf16>
    %8 = vector.shape_cast %7 : vector<1x16x16xbf16> to vector<16x16xbf16>
    %c0_5 = arith.constant 0 : index
    %c0_6 = arith.constant 0 : index
    %c0_7 = arith.constant 0 : index
    %9 = vector.load %arg3[%c0_5, %c0_6, %c0_7] : memref<1x1x16xi32, #tpu.memory_space<vmem>>, vector<1x1x16xi32>
    %10 = vector.shape_cast %9 : vector<1x1x16xi32> to vector<1x16xi32>
    %c0_8 = arith.constant 0 : index
    %c0_9 = arith.constant 0 : index
    %c0_10 = arith.constant 0 : index
    %11 = vector.load %arg4[%c0_8, %c0_9, %c0_10] : memref<1x16x1xi32, #tpu.memory_space<vmem>>, vector<1x16x1xi32>
    %12 = vector.shape_cast %11 : vector<1x16x1xi32> to vector<16x1xi32>
    %13 = arith.truncf %6 : vector<16x128xf32> to vector<16x128xbf16>
    %cst = arith.constant dense<0.000000e+00> : vector<16x128xf32>
    %14 = tpu.matmul %8, %13, %cst {dimension_numbers = #tpu.dot_dimension_numbers<[1], [0], [0], [1], [0, 0, 1, 1], [], []>} : vector<16x16xbf16>, vector<16x128xbf16>, vector<16x128xf32> -> vector<16x128xf32>
    %15 = arith.addf %6, %14 : vector<16x128xf32>
    %16 = vector.extract_strided_slice %15 {offsets = [0, 0], sizes = [16, 32], strides = [1, 1]} : vector<16x128xf32> to vector<16x32xf32>
    %c0_11 = arith.constant 0 : index
    %c0_12 = arith.constant 0 : index
    %c0_13 = arith.constant 0 : index
    %17 = vector.load %arg5[%c0_11, %c0_12, %c0_13] : memref<2x32x128xbf16, #tpu.memory_space<vmem>>, vector<1x32x128xbf16>
    %18 = vector.shape_cast %17 : vector<1x32x128xbf16> to vector<32x128xbf16>
    %19 = arith.truncf %16 : vector<16x32xf32> to vector<16x32xbf16>
    %cst_14 = arith.constant dense<0.000000e+00> : vector<16x128xf32>
    %20 = tpu.matmul %19, %18, %cst_14 {dimension_numbers = #tpu.dot_dimension_numbers<[1], [0], [0], [1], [0, 0, 1, 1], [], []>} : vector<16x32xbf16>, vector<32x128xbf16>, vector<16x128xf32> -> vector<16x128xf32>
    %c0_15 = arith.constant 0 : index
    %c0_16 = arith.constant 0 : index
    %c0_17 = arith.constant 0 : index
    %21 = vector.load %arg6[%c0_15, %c0_16, %c0_17] : memref<2x1x128xf32, #tpu.memory_space<vmem>>, vector<1x1x128xf32>
    %22 = vector.shape_cast %21 : vector<1x1x128xf32> to vector<1x128xf32>
    %23 = vector.broadcast %22 : vector<1x128xf32> to vector<16x128xf32>
    %24 = arith.addf %20, %23 : vector<16x128xf32>
    %cst_18 = arith.constant 0.000000e+00 : f32
    %25 = vector.broadcast %cst_18 : f32 to vector<16x128xf32>
    %26 = arith.maximumf %24, %25 : vector<16x128xf32>
    %27 = arith.addf %26, %6 : vector<16x128xf32>
    %28 = arith.truncf %27 : vector<16x128xf32> to vector<16x128xbf16>
    %cst_19 = arith.constant dense<0.000000e+00> : vector<16x128xf32>
    %29 = tpu.matmul %8, %28, %cst_19 {dimension_numbers = #tpu.dot_dimension_numbers<[1], [0], [0], [1], [0, 0, 1, 1], [], []>} : vector<16x16xbf16>, vector<16x128xbf16>, vector<16x128xf32> -> vector<16x128xf32>
    %30 = arith.addf %27, %29 : vector<16x128xf32>
    %31 = vector.extract_strided_slice %30 {offsets = [0, 0], sizes = [16, 32], strides = [1, 1]} : vector<16x128xf32> to vector<16x32xf32>
    %c1 = arith.constant 1 : index
    %c0_20 = arith.constant 0 : index
    %c0_21 = arith.constant 0 : index
    %32 = vector.load %arg5[%c1, %c0_20, %c0_21] : memref<2x32x128xbf16, #tpu.memory_space<vmem>>, vector<1x32x128xbf16>
    %33 = vector.shape_cast %32 : vector<1x32x128xbf16> to vector<32x128xbf16>
    %34 = arith.truncf %31 : vector<16x32xf32> to vector<16x32xbf16>
    %cst_22 = arith.constant dense<0.000000e+00> : vector<16x128xf32>
    %35 = tpu.matmul %34, %33, %cst_22 {dimension_numbers = #tpu.dot_dimension_numbers<[1], [0], [0], [1], [0, 0, 1, 1], [], []>} : vector<16x32xbf16>, vector<32x128xbf16>, vector<16x128xf32> -> vector<16x128xf32>
    %c1_23 = arith.constant 1 : index
    %c0_24 = arith.constant 0 : index
    %c0_25 = arith.constant 0 : index
    %36 = vector.load %arg6[%c1_23, %c0_24, %c0_25] : memref<2x1x128xf32, #tpu.memory_space<vmem>>, vector<1x1x128xf32>
    %37 = vector.shape_cast %36 : vector<1x1x128xf32> to vector<1x128xf32>
    %38 = vector.broadcast %37 : vector<1x128xf32> to vector<16x128xf32>
    %39 = arith.addf %35, %38 : vector<16x128xf32>
    %40 = arith.addf %39, %27 : vector<16x128xf32>
    %41 = vector.extract_strided_slice %40 {offsets = [0, 0], sizes = [16, 32], strides = [1, 1]} : vector<16x128xf32> to vector<16x32xf32>
    %c0_26 = arith.constant 0 : index
    %c0_27 = arith.constant 0 : index
    %42 = vector.load %arg7[%c0_26, %c0_27] : memref<32x128xbf16, #tpu.memory_space<vmem>>, vector<32x128xbf16>
    %43 = arith.truncf %41 : vector<16x32xf32> to vector<16x32xbf16>
    %cst_28 = arith.constant dense<0.000000e+00> : vector<16x128xf32>
    %44 = tpu.matmul %43, %42, %cst_28 {dimension_numbers = #tpu.dot_dimension_numbers<[1], [0], [0], [1], [0, 0, 1, 1], [], []>} : vector<16x32xbf16>, vector<32x128xbf16>, vector<16x128xf32> -> vector<16x128xf32>
    %c0_29 = arith.constant 0 : index
    %c0_30 = arith.constant 0 : index
    %45 = vector.load %arg8[%c0_29, %c0_30] : memref<32x128xbf16, #tpu.memory_space<vmem>>, vector<32x128xbf16>
    %46 = arith.truncf %41 : vector<16x32xf32> to vector<16x32xbf16>
    %cst_31 = arith.constant dense<0.000000e+00> : vector<16x128xf32>
    %47 = tpu.matmul %46, %45, %cst_31 {dimension_numbers = #tpu.dot_dimension_numbers<[1], [0], [0], [1], [0, 0, 1, 1], [], []>} : vector<16x32xbf16>, vector<32x128xbf16>, vector<16x128xf32> -> vector<16x128xf32>
    %c0_32 = arith.constant 0 : index
    %c0_33 = arith.constant 0 : index
    %48 = vector.load %arg9[%c0_32, %c0_33] : memref<32x128xbf16, #tpu.memory_space<vmem>>, vector<32x128xbf16>
    %49 = arith.truncf %41 : vector<16x32xf32> to vector<16x32xbf16>
    %cst_34 = arith.constant dense<0.000000e+00> : vector<16x128xf32>
    %50 = tpu.matmul %49, %48, %cst_34 {dimension_numbers = #tpu.dot_dimension_numbers<[1], [0], [0], [1], [0, 0, 1, 1], [], []>} : vector<16x32xbf16>, vector<32x128xbf16>, vector<16x128xf32> -> vector<16x128xf32>
    %51 = vector.shape_cast %12 : vector<16x1xi32> to vector<16x1xi32>
    %52 = vector.broadcast %51 : vector<16x1xi32> to vector<16x16xi32>
    %53 = vector.shape_cast %10 : vector<1x16xi32> to vector<1x16xi32>
    %54 = vector.broadcast %53 : vector<1x16xi32> to vector<16x16xi32>
    %55 = arith.cmpi eq, %52, %54 : vector<16x16xi32>
    %cst_35 = arith.constant 0.000000e+00 : f32
    %cst_36 = arith.constant -1.000000e+09 : f32
    %56 = vector.broadcast %cst_35 : f32 to vector<16x16xf32>
    %57 = vector.broadcast %cst_36 : f32 to vector<16x16xf32>
    %58 = arith.select %55, %56, %57 : vector<16x16xi1>, vector<16x16xf32>
    %59 = vector.extract_strided_slice %44 {offsets = [0, 0], sizes = [16, 32], strides = [1, 1]} : vector<16x128xf32> to vector<16x32xf32>
    %60 = vector.extract_strided_slice %47 {offsets = [0, 0], sizes = [16, 32], strides = [1, 1]} : vector<16x128xf32> to vector<16x32xf32>
    %61 = vector.extract_strided_slice %50 {offsets = [0, 0], sizes = [16, 32], strides = [1, 1]} : vector<16x128xf32> to vector<16x32xf32>
    %62 = arith.truncf %59 : vector<16x32xf32> to vector<16x32xbf16>
    %63 = arith.truncf %60 : vector<16x32xf32> to vector<16x32xbf16>
    %cst_37 = arith.constant dense<0.000000e+00> : vector<16x16xf32>
    %64 = tpu.matmul %62, %63, %cst_37 {dimension_numbers = #tpu.dot_dimension_numbers<[1], [1], [0], [0], [0, 0, 1, 0], [], []>} : vector<16x32xbf16>, vector<16x32xbf16>, vector<16x16xf32> -> vector<16x16xf32>
    %cst_38 = arith.constant 0.353553385 : f32
    %65 = vector.broadcast %cst_38 : f32 to vector<16x16xf32>
    %66 = arith.mulf %64, %65 : vector<16x16xf32>
    %67 = arith.addf %66, %58 : vector<16x16xf32>
    %cst_39 = arith.constant dense<0xFF800000> : vector<16xf32>
    %68 = vector.multi_reduction <maximumf>, %67, %cst_39 [1] : vector<16x16xf32> to vector<16xf32>
    %69 = vector.shape_cast %68 : vector<16xf32> to vector<16x1xf32>
    %70 = vector.broadcast %69 : vector<16x1xf32> to vector<16x16xf32>
    %71 = arith.subf %67, %70 : vector<16x16xf32>
    %72 = math.exp %71 : vector<16x16xf32>
    %cst_40 = arith.constant dense<0.000000e+00> : vector<16xf32>
    %73 = vector.multi_reduction <add>, %72, %cst_40 [1] : vector<16x16xf32> to vector<16xf32>
    %74 = vector.shape_cast %73 : vector<16xf32> to vector<16x1xf32>
    %75 = tpu.reciprocal %74 {approx = true} : vector<16x1xf32> -> vector<16x1xf32>
    %76 = vector.broadcast %75 : vector<16x1xf32> to vector<16x16xf32>
    %77 = arith.mulf %72, %76 : vector<16x16xf32>
    %78 = arith.truncf %77 : vector<16x16xf32> to vector<16x16xbf16>
    %79 = arith.truncf %61 : vector<16x32xf32> to vector<16x32xbf16>
    %cst_41 = arith.constant dense<0.000000e+00> : vector<16x32xf32>
    %80 = tpu.matmul %78, %79, %cst_41 {dimension_numbers = #tpu.dot_dimension_numbers<[1], [0], [0], [1], [0, 0, 1, 1], [], []>} : vector<16x16xbf16>, vector<16x32xbf16>, vector<16x32xf32> -> vector<16x32xf32>
    %c0_42 = arith.constant 0 : index
    %c0_43 = arith.constant 0 : index
    %81 = vector.load %arg26[%c0_42, %c0_43] : memref<16x128xf32, #tpu.memory_space<vmem>>, vector<16x32xf32>
    tpu.vector_store %arg26[%c0_42, %c0_43], %80 {strides = array<i32>} : memref<16x128xf32, #tpu.memory_space<vmem>>, vector<16x32xf32>,
    %82 = vector.extract_strided_slice %44 {offsets = [0, 32], sizes = [16, 32], strides = [1, 1]} : vector<16x128xf32> to vector<16x32xf32>
    %83 = vector.extract_strided_slice %47 {offsets = [0, 32], sizes = [16, 32], strides = [1, 1]} : vector<16x128xf32> to vector<16x32xf32>
    %84 = vector.extract_strided_slice %50 {offsets = [0, 32], sizes = [16, 32], strides = [1, 1]} : vector<16x128xf32> to vector<16x32xf32>
    %85 = arith.truncf %82 : vector<16x32xf32> to vector<16x32xbf16>
    %86 = arith.truncf %83 : vector<16x32xf32> to vector<16x32xbf16>
    %cst_44 = arith.constant dense<0.000000e+00> : vector<16x16xf32>
    %87 = tpu.matmul %85, %86, %cst_44 {dimension_numbers = #tpu.dot_dimension_numbers<[1], [1], [0], [0], [0, 0, 1, 0], [], []>} : vector<16x32xbf16>, vector<16x32xbf16>, vector<16x16xf32> -> vector<16x16xf32>
    %cst_45 = arith.constant 0.353553385 : f32
    %88 = vector.broadcast %cst_45 : f32 to vector<16x16xf32>
    %89 = arith.mulf %87, %88 : vector<16x16xf32>
    %90 = arith.addf %89, %58 : vector<16x16xf32>
    %cst_46 = arith.constant dense<0xFF800000> : vector<16xf32>
    %91 = vector.multi_reduction <maximumf>, %90, %cst_46 [1] : vector<16x16xf32> to vector<16xf32>
    %92 = vector.shape_cast %91 : vector<16xf32> to vector<16x1xf32>
    %93 = vector.broadcast %92 : vector<16x1xf32> to vector<16x16xf32>
    %94 = arith.subf %90, %93 : vector<16x16xf32>
    %95 = math.exp %94 : vector<16x16xf32>
    %cst_47 = arith.constant dense<0.000000e+00> : vector<16xf32>
    %96 = vector.multi_reduction <add>, %95, %cst_47 [1] : vector<16x16xf32> to vector<16xf32>
    %97 = vector.shape_cast %96 : vector<16xf32> to vector<16x1xf32>
    %98 = tpu.reciprocal %97 {approx = true} : vector<16x1xf32> -> vector<16x1xf32>
    %99 = vector.broadcast %98 : vector<16x1xf32> to vector<16x16xf32>
    %100 = arith.mulf %95, %99 : vector<16x16xf32>
    %101 = arith.truncf %100 : vector<16x16xf32> to vector<16x16xbf16>
    %102 = arith.truncf %84 : vector<16x32xf32> to vector<16x32xbf16>
    %cst_48 = arith.constant dense<0.000000e+00> : vector<16x32xf32>
    %103 = tpu.matmul %101, %102, %cst_48 {dimension_numbers = #tpu.dot_dimension_numbers<[1], [0], [0], [1], [0, 0, 1, 1], [], []>} : vector<16x16xbf16>, vector<16x32xbf16>, vector<16x32xf32> -> vector<16x32xf32>
    %c0_49 = arith.constant 0 : index
    %c32 = arith.constant 32 : index
    %104 = vector.load %arg26[%c0_49, %c32] : memref<16x128xf32, #tpu.memory_space<vmem>>, vector<16x32xf32>
    tpu.vector_store %arg26[%c0_49, %c32], %103 {strides = array<i32>} : memref<16x128xf32, #tpu.memory_space<vmem>>, vector<16x32xf32>,
    %105 = vector.extract_strided_slice %44 {offsets = [0, 64], sizes = [16, 32], strides = [1, 1]} : vector<16x128xf32> to vector<16x32xf32>
    %106 = vector.extract_strided_slice %47 {offsets = [0, 64], sizes = [16, 32], strides = [1, 1]} : vector<16x128xf32> to vector<16x32xf32>
    %107 = vector.extract_strided_slice %50 {offsets = [0, 64], sizes = [16, 32], strides = [1, 1]} : vector<16x128xf32> to vector<16x32xf32>
    %108 = arith.truncf %105 : vector<16x32xf32> to vector<16x32xbf16>
    %109 = arith.truncf %106 : vector<16x32xf32> to vector<16x32xbf16>
    %cst_50 = arith.constant dense<0.000000e+00> : vector<16x16xf32>
    %110 = tpu.matmul %108, %109, %cst_50 {dimension_numbers = #tpu.dot_dimension_numbers<[1], [1], [0], [0], [0, 0, 1, 0], [], []>} : vector<16x32xbf16>, vector<16x32xbf16>, vector<16x16xf32> -> vector<16x16xf32>
    %cst_51 = arith.constant 0.353553385 : f32
    %111 = vector.broadcast %cst_51 : f32 to vector<16x16xf32>
    %112 = arith.mulf %110, %111 : vector<16x16xf32>
    %113 = arith.addf %112, %58 : vector<16x16xf32>
    %cst_52 = arith.constant dense<0xFF800000> : vector<16xf32>
    %114 = vector.multi_reduction <maximumf>, %113, %cst_52 [1] : vector<16x16xf32> to vector<16xf32>
    %115 = vector.shape_cast %114 : vector<16xf32> to vector<16x1xf32>
    %116 = vector.broadcast %115 : vector<16x1xf32> to vector<16x16xf32>
    %117 = arith.subf %113, %116 : vector<16x16xf32>
    %118 = math.exp %117 : vector<16x16xf32>
    %cst_53 = arith.constant dense<0.000000e+00> : vector<16xf32>
    %119 = vector.multi_reduction <add>, %118, %cst_53 [1] : vector<16x16xf32> to vector<16xf32>
    %120 = vector.shape_cast %119 : vector<16xf32> to vector<16x1xf32>
    %121 = tpu.reciprocal %120 {approx = true} : vector<16x1xf32> -> vector<16x1xf32>
    %122 = vector.broadcast %121 : vector<16x1xf32> to vector<16x16xf32>
    %123 = arith.mulf %118, %122 : vector<16x16xf32>
    %124 = arith.truncf %123 : vector<16x16xf32> to vector<16x16xbf16>
    %125 = arith.truncf %107 : vector<16x32xf32> to vector<16x32xbf16>
    %cst_54 = arith.constant dense<0.000000e+00> : vector<16x32xf32>
    %126 = tpu.matmul %124, %125, %cst_54 {dimension_numbers = #tpu.dot_dimension_numbers<[1], [0], [0], [1], [0, 0, 1, 1], [], []>} : vector<16x16xbf16>, vector<16x32xbf16>, vector<16x32xf32> -> vector<16x32xf32>
    %c0_55 = arith.constant 0 : index
    %c64 = arith.constant 64 : index
    %127 = vector.load %arg26[%c0_55, %c64] : memref<16x128xf32, #tpu.memory_space<vmem>>, vector<16x32xf32>
    tpu.vector_store %arg26[%c0_55, %c64], %126 {strides = array<i32>} : memref<16x128xf32, #tpu.memory_space<vmem>>, vector<16x32xf32>,
    %128 = vector.extract_strided_slice %44 {offsets = [0, 96], sizes = [16, 32], strides = [1, 1]} : vector<16x128xf32> to vector<16x32xf32>
    %129 = vector.extract_strided_slice %47 {offsets = [0, 96], sizes = [16, 32], strides = [1, 1]} : vector<16x128xf32> to vector<16x32xf32>
    %130 = vector.extract_strided_slice %50 {offsets = [0, 96], sizes = [16, 32], strides = [1, 1]} : vector<16x128xf32> to vector<16x32xf32>
    %131 = arith.truncf %128 : vector<16x32xf32> to vector<16x32xbf16>
    %132 = arith.truncf %129 : vector<16x32xf32> to vector<16x32xbf16>
    %cst_56 = arith.constant dense<0.000000e+00> : vector<16x16xf32>
    %133 = tpu.matmul %131, %132, %cst_56 {dimension_numbers = #tpu.dot_dimension_numbers<[1], [1], [0], [0], [0, 0, 1, 0], [], []>} : vector<16x32xbf16>, vector<16x32xbf16>, vector<16x16xf32> -> vector<16x16xf32>
    %cst_57 = arith.constant 0.353553385 : f32
    %134 = vector.broadcast %cst_57 : f32 to vector<16x16xf32>
    %135 = arith.mulf %133, %134 : vector<16x16xf32>
    %136 = arith.addf %135, %58 : vector<16x16xf32>
    %cst_58 = arith.constant dense<0xFF800000> : vector<16xf32>
    %137 = vector.multi_reduction <maximumf>, %136, %cst_58 [1] : vector<16x16xf32> to vector<16xf32>
    %138 = vector.shape_cast %137 : vector<16xf32> to vector<16x1xf32>
    %139 = vector.broadcast %138 : vector<16x1xf32> to vector<16x16xf32>
    %140 = arith.subf %136, %139 : vector<16x16xf32>
    %141 = math.exp %140 : vector<16x16xf32>
    %cst_59 = arith.constant dense<0.000000e+00> : vector<16xf32>
    %142 = vector.multi_reduction <add>, %141, %cst_59 [1] : vector<16x16xf32> to vector<16xf32>
    %143 = vector.shape_cast %142 : vector<16xf32> to vector<16x1xf32>
    %144 = tpu.reciprocal %143 {approx = true} : vector<16x1xf32> -> vector<16x1xf32>
    %145 = vector.broadcast %144 : vector<16x1xf32> to vector<16x16xf32>
    %146 = arith.mulf %141, %145 : vector<16x16xf32>
    %147 = arith.truncf %146 : vector<16x16xf32> to vector<16x16xbf16>
    %148 = arith.truncf %130 : vector<16x32xf32> to vector<16x32xbf16>
    %cst_60 = arith.constant dense<0.000000e+00> : vector<16x32xf32>
    %149 = tpu.matmul %147, %148, %cst_60 {dimension_numbers = #tpu.dot_dimension_numbers<[1], [0], [0], [1], [0, 0, 1, 1], [], []>} : vector<16x16xbf16>, vector<16x32xbf16>, vector<16x32xf32> -> vector<16x32xf32>
    %c0_61 = arith.constant 0 : index
    %c96 = arith.constant 96 : index
    %150 = vector.load %arg26[%c0_61, %c96] : memref<16x128xf32, #tpu.memory_space<vmem>>, vector<16x32xf32>
    tpu.vector_store %arg26[%c0_61, %c96], %149 {strides = array<i32>} : memref<16x128xf32, #tpu.memory_space<vmem>>, vector<16x32xf32>,
    %c0_62 = arith.constant 0 : index
    %c0_63 = arith.constant 0 : index
    %151 = vector.load %arg26[%c0_62, %c0_63] : memref<16x128xf32, #tpu.memory_space<vmem>>, vector<16x128xf32>
    %c0_64 = arith.constant 0 : index
    %c0_65 = arith.constant 0 : index
    %152 = vector.load %arg10[%c0_64, %c0_65] : memref<128x128xbf16, #tpu.memory_space<vmem>>, vector<128x128xbf16>
    %153 = arith.truncf %151 : vector<16x128xf32> to vector<16x128xbf16>
    %cst_66 = arith.constant dense<0.000000e+00> : vector<16x128xf32>
    %154 = tpu.matmul %153, %152, %cst_66 {dimension_numbers = #tpu.dot_dimension_numbers<[1], [0], [0], [1], [0, 0, 1, 1], [], []>} : vector<16x128xbf16>, vector<128x128xbf16>, vector<16x128xf32> -> vector<16x128xf32>
    %155 = arith.addf %40, %154 : vector<16x128xf32>
    %c0_67 = arith.constant 0 : index
    %c0_68 = arith.constant 0 : index
    %156 = vector.load %arg15[%c0_67, %c0_68] : memref<1x128xf32, #tpu.memory_space<vmem>>, vector<1x128xf32>
    %c0_69 = arith.constant 0 : index
    %c0_70 = arith.constant 0 : index
    %157 = vector.load %arg16[%c0_69, %c0_70] : memref<1x128xf32, #tpu.memory_space<vmem>>, vector<1x128xf32>
    %cst_71 = arith.constant dense<0.000000e+00> : vector<16xf32>
    %158 = vector.multi_reduction <add>, %155, %cst_71 [1] : vector<16x128xf32> to vector<16xf32>
    %159 = vector.shape_cast %158 : vector<16xf32> to vector<16x1xf32>
    %cst_72 = arith.constant 3.125000e-02 : f32
    %160 = vector.broadcast %cst_72 : f32 to vector<16x1xf32>
    %161 = arith.mulf %159, %160 : vector<16x1xf32>
    %162 = vector.broadcast %161 : vector<16x1xf32> to vector<16x128xf32>
    %163 = arith.subf %155, %162 : vector<16x128xf32>
    %164 = vector.broadcast %4 : vector<1x128xf32> to vector<16x128xf32>
    %165 = arith.mulf %163, %164 : vector<16x128xf32>
    %166 = arith.mulf %165, %165 : vector<16x128xf32>
    %cst_73 = arith.constant dense<0.000000e+00> : vector<16xf32>
    %167 = vector.multi_reduction <add>, %166, %cst_73 [1] : vector<16x128xf32> to vector<16xf32>
    %168 = vector.shape_cast %167 : vector<16xf32> to vector<16x1xf32>
    %cst_74 = arith.constant 3.125000e-02 : f32
    %169 = vector.broadcast %cst_74 : f32 to vector<16x1xf32>
    %170 = arith.mulf %168, %169 : vector<16x1xf32>
    %cst_75 = arith.constant 9.99999974E-6 : f32
    %171 = vector.broadcast %cst_75 : f32 to vector<16x1xf32>
    %172 = arith.addf %170, %171 : vector<16x1xf32>
    %173 = math.rsqrt %172 : vector<16x1xf32>
    %174 = vector.broadcast %173 : vector<16x1xf32> to vector<16x128xf32>
    %175 = arith.mulf %165, %174 : vector<16x128xf32>
    %176 = vector.broadcast %156 : vector<1x128xf32> to vector<16x128xf32>
    %177 = arith.mulf %175, %176 : vector<16x128xf32>
    %178 = vector.broadcast %157 : vector<1x128xf32> to vector<16x128xf32>
    %179 = arith.addf %177, %178 : vector<16x128xf32>
    %180 = vector.extract_strided_slice %179 {offsets = [0, 0], sizes = [16, 32], strides = [1, 1]} : vector<16x128xf32> to vector<16x32xf32>
    %c0_76 = arith.constant 0 : index
    %c0_77 = arith.constant 0 : index
    %181 = vector.load %arg11[%c0_76, %c0_77] : memref<32x128xbf16, #tpu.memory_space<vmem>>, vector<32x128xbf16>
    %182 = arith.truncf %180 : vector<16x32xf32> to vector<16x32xbf16>
    %cst_78 = arith.constant dense<0.000000e+00> : vector<16x128xf32>
    %183 = tpu.matmul %182, %181, %cst_78 {dimension_numbers = #tpu.dot_dimension_numbers<[1], [0], [0], [1], [0, 0, 1, 1], [], []>} : vector<16x32xbf16>, vector<32x128xbf16>, vector<16x128xf32> -> vector<16x128xf32>
    %c0_79 = arith.constant 0 : index
    %c0_80 = arith.constant 0 : index
    %184 = vector.load %arg12[%c0_79, %c0_80] : memref<1x128xf32, #tpu.memory_space<vmem>>, vector<1x128xf32>
    %185 = vector.broadcast %184 : vector<1x128xf32> to vector<16x128xf32>
    %186 = arith.addf %183, %185 : vector<16x128xf32>
    %cst_81 = arith.constant 0.000000e+00 : f32
    %187 = vector.broadcast %cst_81 : f32 to vector<16x128xf32>
    %188 = arith.maximumf %186, %187 : vector<16x128xf32>
    %189 = vector.extract_strided_slice %188 {offsets = [0, 0], sizes = [16, 32], strides = [1, 1]} : vector<16x128xf32> to vector<16x32xf32>
    %c0_82 = arith.constant 0 : index
    %c0_83 = arith.constant 0 : index
    %190 = vector.load %arg13[%c0_82, %c0_83] : memref<32x128xbf16, #tpu.memory_space<vmem>>, vector<32x128xbf16>
    %191 = arith.truncf %189 : vector<16x32xf32> to vector<16x32xbf16>
    %cst_84 = arith.constant dense<0.000000e+00> : vector<16x128xf32>
    %192 = tpu.matmul %191, %190, %cst_84 {dimension_numbers = #tpu.dot_dimension_numbers<[1], [0], [0], [1], [0, 0, 1, 1], [], []>} : vector<16x32xbf16>, vector<32x128xbf16>, vector<16x128xf32> -> vector<16x128xf32>
    %c0_85 = arith.constant 0 : index
    %c0_86 = arith.constant 0 : index
    %193 = vector.load %arg14[%c0_85, %c0_86] : memref<1x128xf32, #tpu.memory_space<vmem>>, vector<1x128xf32>
    %194 = vector.broadcast %193 : vector<1x128xf32> to vector<16x128xf32>
    %195 = arith.addf %192, %194 : vector<16x128xf32>
    %196 = arith.addf %179, %195 : vector<16x128xf32>
    %c0_87 = arith.constant 0 : index
    %c0_88 = arith.constant 0 : index
    %197 = vector.load %arg17[%c0_87, %c0_88] : memref<1x128xf32, #tpu.memory_space<vmem>>, vector<1x128xf32>
    %c0_89 = arith.constant 0 : index
    %c0_90 = arith.constant 0 : index
    %198 = vector.load %arg18[%c0_89, %c0_90] : memref<1x128xf32, #tpu.memory_space<vmem>>, vector<1x128xf32>
    %cst_91 = arith.constant dense<0.000000e+00> : vector<16xf32>
    %199 = vector.multi_reduction <add>, %196, %cst_91 [1] : vector<16x128xf32> to vector<16xf32>
    %200 = vector.shape_cast %199 : vector<16xf32> to vector<16x1xf32>
    %cst_92 = arith.constant 3.125000e-02 : f32
    %201 = vector.broadcast %cst_92 : f32 to vector<16x1xf32>
    %202 = arith.mulf %200, %201 : vector<16x1xf32>
    %203 = vector.broadcast %202 : vector<16x1xf32> to vector<16x128xf32>
    %204 = arith.subf %196, %203 : vector<16x128xf32>
    %205 = vector.broadcast %4 : vector<1x128xf32> to vector<16x128xf32>
    %206 = arith.mulf %204, %205 : vector<16x128xf32>
    %207 = arith.mulf %206, %206 : vector<16x128xf32>
    %cst_93 = arith.constant dense<0.000000e+00> : vector<16xf32>
    %208 = vector.multi_reduction <add>, %207, %cst_93 [1] : vector<16x128xf32> to vector<16xf32>
    %209 = vector.shape_cast %208 : vector<16xf32> to vector<16x1xf32>
    %cst_94 = arith.constant 3.125000e-02 : f32
    %210 = vector.broadcast %cst_94 : f32 to vector<16x1xf32>
    %211 = arith.mulf %209, %210 : vector<16x1xf32>
    %cst_95 = arith.constant 9.99999974E-6 : f32
    %212 = vector.broadcast %cst_95 : f32 to vector<16x1xf32>
    %213 = arith.addf %211, %212 : vector<16x1xf32>
    %214 = math.rsqrt %213 : vector<16x1xf32>
    %215 = vector.broadcast %214 : vector<16x1xf32> to vector<16x128xf32>
    %216 = arith.mulf %206, %215 : vector<16x128xf32>
    %217 = vector.broadcast %197 : vector<1x128xf32> to vector<16x128xf32>
    %218 = arith.mulf %216, %217 : vector<16x128xf32>
    %219 = vector.broadcast %198 : vector<1x128xf32> to vector<16x128xf32>
    %220 = arith.addf %218, %219 : vector<16x128xf32>
    %221 = tpu.iota {dimensions = array<i32: 0>} : vector<2x16xi32>
    %222 = vector.shape_cast %10 : vector<1x16xi32> to vector<1x16xi32>
    %223 = vector.broadcast %222 : vector<1x16xi32> to vector<2x16xi32>
    %224 = arith.cmpi eq, %221, %223 : vector<2x16xi32>
    %225 = arith.extui %224 : vector<2x16xi1> to vector<2x16xi32>
    %226 = arith.sitofp %225 : vector<2x16xi32> to vector<2x16xf32>
    %227 = arith.truncf %226 : vector<2x16xf32> to vector<2x16xbf16>
    %228 = arith.truncf %220 : vector<16x128xf32> to vector<16x128xbf16>
    %cst_96 = arith.constant dense<0.000000e+00> : vector<2x128xf32>
    %229 = tpu.matmul %227, %228, %cst_96 {dimension_numbers = #tpu.dot_dimension_numbers<[1], [0], [0], [1], [0, 0, 1, 1], [], []>} : vector<2x16xbf16>, vector<16x128xbf16>, vector<2x128xf32> -> vector<2x128xf32>
    %cst_97 = arith.constant dense<0.000000e+00> : vector<2xf32>
    %230 = vector.multi_reduction <add>, %226, %cst_97 [1] : vector<2x16xf32> to vector<2xf32>
    %231 = vector.shape_cast %230 : vector<2xf32> to vector<2x1xf32>
    %cst_98 = arith.constant 1.000000e+00 : f32
    %232 = vector.broadcast %cst_98 : f32 to vector<2x1xf32>
    %233 = arith.maximumf %231, %232 : vector<2x1xf32>
    %234 = vector.broadcast %233 : vector<2x1xf32> to vector<2x128xf32>
    %235 = arith.divf %229, %234 : vector<2x128xf32>
    %236 = vector.extract_strided_slice %235 {offsets = [0, 0], sizes = [2, 32], strides = [1, 1]} : vector<2x128xf32> to vector<2x32xf32>
    %cst_99 = arith.constant 0.000000e+00 : f32
    %237 = vector.broadcast %cst_99 : f32 to vector<2x2xf32>
    %c0_100 = arith.constant 0 : index
    %c0_101 = arith.constant 0 : index
    %c0_102 = arith.constant 0 : index
    %238 = vector.load %arg19[%c0_100, %c0_101, %c0_102] : memref<2x32x128xbf16, #tpu.memory_space<vmem>>, vector<1x32x128xbf16>
    %239 = vector.shape_cast %238 : vector<1x32x128xbf16> to vector<32x128xbf16>
    %240 = arith.truncf %236 : vector<2x32xf32> to vector<2x32xbf16>
    %cst_103 = arith.constant dense<0.000000e+00> : vector<2x128xf32>
    %241 = tpu.matmul %240, %239, %cst_103 {dimension_numbers = #tpu.dot_dimension_numbers<[1], [0], [0], [1], [0, 0, 1, 1], [], []>} : vector<2x32xbf16>, vector<32x128xbf16>, vector<2x128xf32> -> vector<2x128xf32>
    %c0_104 = arith.constant 0 : index
    %c0_105 = arith.constant 0 : index
    %c0_106 = arith.constant 0 : index
    %242 = vector.load %arg20[%c0_104, %c0_105, %c0_106] : memref<2x1x128xf32, #tpu.memory_space<vmem>>, vector<1x1x128xf32>
    %243 = vector.shape_cast %242 : vector<1x1x128xf32> to vector<1x128xf32>
    %244 = vector.broadcast %243 : vector<1x128xf32> to vector<2x128xf32>
    %245 = arith.addf %241, %244 : vector<2x128xf32>
    %cst_107 = arith.constant 0.000000e+00 : f32
    %246 = vector.broadcast %cst_107 : f32 to vector<2x128xf32>
    %247 = arith.cmpf ogt, %245, %246 : vector<2x128xf32>
    %cst_108 = arith.constant 0.00999999977 : f32
    %248 = vector.broadcast %cst_108 : f32 to vector<2x128xf32>
    %249 = arith.mulf %248, %245 : vector<2x128xf32>
    %250 = arith.select %247, %245, %249 : vector<2x128xi1>, vector<2x128xf32>
    %251 = vector.extract_strided_slice %250 {offsets = [0, 0], sizes = [2, 32], strides = [1, 1]} : vector<2x128xf32> to vector<2x32xf32>
    %c0_109 = arith.constant 0 : index
    %c0_110 = arith.constant 0 : index
    %c0_111 = arith.constant 0 : index
    %252 = vector.load %arg21[%c0_109, %c0_110, %c0_111] : memref<2x32x128xbf16, #tpu.memory_space<vmem>>, vector<1x32x128xbf16>
    %253 = vector.shape_cast %252 : vector<1x32x128xbf16> to vector<32x128xbf16>
    %254 = arith.truncf %251 : vector<2x32xf32> to vector<2x32xbf16>
    %cst_112 = arith.constant dense<0.000000e+00> : vector<2x128xf32>
    %255 = tpu.matmul %254, %253, %cst_112 {dimension_numbers = #tpu.dot_dimension_numbers<[1], [0], [0], [1], [0, 0, 1, 1], [], []>} : vector<2x32xbf16>, vector<32x128xbf16>, vector<2x128xf32> -> vector<2x128xf32>
    %c0_113 = arith.constant 0 : index
    %c0_114 = arith.constant 0 : index
    %c0_115 = arith.constant 0 : index
    %256 = vector.load %arg22[%c0_113, %c0_114, %c0_115] : memref<2x1x128xf32, #tpu.memory_space<vmem>>, vector<1x1x128xf32>
    %257 = vector.shape_cast %256 : vector<1x1x128xf32> to vector<1x128xf32>
    %258 = vector.broadcast %257 : vector<1x128xf32> to vector<2x128xf32>
    %259 = arith.addf %255, %258 : vector<2x128xf32>
    %cst_116 = arith.constant 0.000000e+00 : f32
    %260 = vector.broadcast %cst_116 : f32 to vector<2x128xf32>
    %261 = arith.cmpf ogt, %259, %260 : vector<2x128xf32>
    %cst_117 = arith.constant 0.00999999977 : f32
    %262 = vector.broadcast %cst_117 : f32 to vector<2x128xf32>
    %263 = arith.mulf %262, %259 : vector<2x128xf32>
    %264 = arith.select %261, %259, %263 : vector<2x128xi1>, vector<2x128xf32>
    %265 = vector.extract_strided_slice %264 {offsets = [0, 0], sizes = [2, 32], strides = [1, 1]} : vector<2x128xf32> to vector<2x32xf32>
    %c0_118 = arith.constant 0 : index
    %c0_119 = arith.constant 0 : index
    %c0_120 = arith.constant 0 : index
    %266 = vector.load %arg23[%c0_118, %c0_119, %c0_120] : memref<2x32x2xf32, #tpu.memory_space<vmem>>, vector<1x32x2xf32>
    %267 = vector.shape_cast %266 : vector<1x32x2xf32> to vector<32x2xf32>
    %268 = arith.truncf %265 : vector<2x32xf32> to vector<2x32xbf16>
    %269 = arith.truncf %267 : vector<32x2xf32> to vector<32x2xbf16>
    %cst_121 = arith.constant dense<0.000000e+00> : vector<2x2xf32>
    %270 = tpu.matmul %268, %269, %cst_121 {dimension_numbers = #tpu.dot_dimension_numbers<[1], [0], [0], [1], [0, 0, 1, 1], [], []>} : vector<2x32xbf16>, vector<32x2xbf16>, vector<2x2xf32> -> vector<2x2xf32>
    %271 = arith.addf %237, %270 : vector<2x2xf32>
    %c0_122 = arith.constant 0 : index
    %c0_123 = arith.constant 0 : index
    %c0_124 = arith.constant 0 : index
    %272 = vector.load %arg24[%c0_122, %c0_123, %c0_124] : memref<2x1x2xf32, #tpu.memory_space<vmem>>, vector<1x1x2xf32>
    %273 = vector.shape_cast %272 : vector<1x1x2xf32> to vector<1x2xf32>
    %274 = vector.broadcast %273 : vector<1x2xf32> to vector<2x2xf32>
    %275 = arith.addf %271, %274 : vector<2x2xf32>
    %c1_125 = arith.constant 1 : index
    %c0_126 = arith.constant 0 : index
    %c0_127 = arith.constant 0 : index
    %276 = vector.load %arg19[%c1_125, %c0_126, %c0_127] : memref<2x32x128xbf16, #tpu.memory_space<vmem>>, vector<1x32x128xbf16>
    %277 = vector.shape_cast %276 : vector<1x32x128xbf16> to vector<32x128xbf16>
    %278 = arith.truncf %236 : vector<2x32xf32> to vector<2x32xbf16>
    %cst_128 = arith.constant dense<0.000000e+00> : vector<2x128xf32>
    %279 = tpu.matmul %278, %277, %cst_128 {dimension_numbers = #tpu.dot_dimension_numbers<[1], [0], [0], [1], [0, 0, 1, 1], [], []>} : vector<2x32xbf16>, vector<32x128xbf16>, vector<2x128xf32> -> vector<2x128xf32>
    %c1_129 = arith.constant 1 : index
    %c0_130 = arith.constant 0 : index
    %c0_131 = arith.constant 0 : index
    %280 = vector.load %arg20[%c1_129, %c0_130, %c0_131] : memref<2x1x128xf32, #tpu.memory_space<vmem>>, vector<1x1x128xf32>
    %281 = vector.shape_cast %280 : vector<1x1x128xf32> to vector<1x128xf32>
    %282 = vector.broadcast %281 : vector<1x128xf32> to vector<2x128xf32>
    %283 = arith.addf %279, %282 : vector<2x128xf32>
    %cst_132 = arith.constant 0.000000e+00 : f32
    %284 = vector.broadcast %cst_132 : f32 to vector<2x128xf32>
    %285 = arith.cmpf ogt, %283, %284 : vector<2x128xf32>
    %cst_133 = arith.constant 0.00999999977 : f32
    %286 = vector.broadcast %cst_133 : f32 to vector<2x128xf32>
    %287 = arith.mulf %286, %283 : vector<2x128xf32>
    %288 = arith.select %285, %283, %287 : vector<2x128xi1>, vector<2x128xf32>
    %289 = vector.extract_strided_slice %288 {offsets = [0, 0], sizes = [2, 32], strides = [1, 1]} : vector<2x128xf32> to vector<2x32xf32>
    %c1_134 = arith.constant 1 : index
    %c0_135 = arith.constant 0 : index
    %c0_136 = arith.constant 0 : index
    %290 = vector.load %arg21[%c1_134, %c0_135, %c0_136] : memref<2x32x128xbf16, #tpu.memory_space<vmem>>, vector<1x32x128xbf16>
    %291 = vector.shape_cast %290 : vector<1x32x128xbf16> to vector<32x128xbf16>
    %292 = arith.truncf %289 : vector<2x32xf32> to vector<2x32xbf16>
    %cst_137 = arith.constant dense<0.000000e+00> : vector<2x128xf32>
    %293 = tpu.matmul %292, %291, %cst_137 {dimension_numbers = #tpu.dot_dimension_numbers<[1], [0], [0], [1], [0, 0, 1, 1], [], []>} : vector<2x32xbf16>, vector<32x128xbf16>, vector<2x128xf32> -> vector<2x128xf32>
    %c1_138 = arith.constant 1 : index
    %c0_139 = arith.constant 0 : index
    %c0_140 = arith.constant 0 : index
    %294 = vector.load %arg22[%c1_138, %c0_139, %c0_140] : memref<2x1x128xf32, #tpu.memory_space<vmem>>, vector<1x1x128xf32>
    %295 = vector.shape_cast %294 : vector<1x1x128xf32> to vector<1x128xf32>
    %296 = vector.broadcast %295 : vector<1x128xf32> to vector<2x128xf32>
    %297 = arith.addf %293, %296 : vector<2x128xf32>
    %cst_141 = arith.constant 0.000000e+00 : f32
    %298 = vector.broadcast %cst_141 : f32 to vector<2x128xf32>
    %299 = arith.cmpf ogt, %297, %298 : vector<2x128xf32>
    %cst_142 = arith.constant 0.00999999977 : f32
    %300 = vector.broadcast %cst_142 : f32 to vector<2x128xf32>
    %301 = arith.mulf %300, %297 : vector<2x128xf32>
    %302 = arith.select %299, %297, %301 : vector<2x128xi1>, vector<2x128xf32>
    %303 = vector.extract_strided_slice %302 {offsets = [0, 0], sizes = [2, 32], strides = [1, 1]} : vector<2x128xf32> to vector<2x32xf32>
    %c1_143 = arith.constant 1 : index
    %c0_144 = arith.constant 0 : index
    %c0_145 = arith.constant 0 : index
    %304 = vector.load %arg23[%c1_143, %c0_144, %c0_145] : memref<2x32x2xf32, #tpu.memory_space<vmem>>, vector<1x32x2xf32>
    %305 = vector.shape_cast %304 : vector<1x32x2xf32> to vector<32x2xf32>
    %306 = arith.truncf %303 : vector<2x32xf32> to vector<2x32xbf16>
    %307 = arith.truncf %305 : vector<32x2xf32> to vector<32x2xbf16>
    %cst_146 = arith.constant dense<0.000000e+00> : vector<2x2xf32>
    %308 = tpu.matmul %306, %307, %cst_146 {dimension_numbers = #tpu.dot_dimension_numbers<[1], [0], [0], [1], [0, 0, 1, 1], [], []>} : vector<2x32xbf16>, vector<32x2xbf16>, vector<2x2xf32> -> vector<2x2xf32>
    %309 = arith.addf %275, %308 : vector<2x2xf32>
    %c1_147 = arith.constant 1 : index
    %c0_148 = arith.constant 0 : index
    %c0_149 = arith.constant 0 : index
    %310 = vector.load %arg24[%c1_147, %c0_148, %c0_149] : memref<2x1x2xf32, #tpu.memory_space<vmem>>, vector<1x1x2xf32>
    %311 = vector.shape_cast %310 : vector<1x1x2xf32> to vector<1x2xf32>
    %312 = vector.broadcast %311 : vector<1x2xf32> to vector<2x2xf32>
    %313 = arith.addf %309, %312 : vector<2x2xf32>
    %c0_150 = arith.constant 0 : index
    %c0_151 = arith.constant 0 : index
    %c0_152 = arith.constant 0 : index
    %314 = vector.load %arg25[%c0_150, %c0_151, %c0_152] : memref<1x2x2xf32, #tpu.memory_space<vmem>>, vector<1x2x2xf32>
    %315 = vector.shape_cast %314 : vector<1x2x2xf32> to vector<2x2xf32>
    %316 = vector.shape_cast %313 : vector<2x2xf32> to vector<1x2x2xf32>
    tpu.vector_store %arg25[%c0_150, %c0_151, %c0_152], %316 {strides = array<i32>} : memref<1x2x2xf32, #tpu.memory_space<vmem>>, vector<1x2x2xf32>,
    return
  }
  func.func @transform_0(%arg0: i32) -> (i32, i32, i32) {
    %c0_i32 = arith.constant 0 : i32
    %c0_i32_0 = arith.constant 0 : i32
    %c0_i32_1 = arith.constant 0 : i32
    return %arg0, %c0_i32, %c0_i32_0 : i32, i32, i32
  }
  func.func @transform_1(%arg0: i32) -> (i32, i32, i32) {
    %c0_i32 = arith.constant 0 : i32
    %c0_i32_0 = arith.constant 0 : i32
    %c0_i32_1 = arith.constant 0 : i32
    return %arg0, %c0_i32, %c0_i32_0 : i32, i32, i32
  }
  func.func @transform_2(%arg0: i32) -> (i32, i32, i32) {
    %c0_i32 = arith.constant 0 : i32
    %c0_i32_0 = arith.constant 0 : i32
    %c0_i32_1 = arith.constant 0 : i32
    return %arg0, %c0_i32, %c0_i32_0 : i32, i32, i32
  }
  func.func @transform_3(%arg0: i32) -> (i32, i32, i32) {
    %c0_i32 = arith.constant 0 : i32
    %c0_i32_0 = arith.constant 0 : i32
    %c0_i32_1 = arith.constant 0 : i32
    return %arg0, %c0_i32, %c0_i32_0 : i32, i32, i32
  }
  func.func @transform_4(%arg0: i32) -> (i32, i32, i32) {
    %c0_i32 = arith.constant 0 : i32
    %c0_i32_0 = arith.constant 0 : i32
    %c0_i32_1 = arith.constant 0 : i32
    %c0_i32_2 = arith.constant 0 : i32
    return %c0_i32, %c0_i32_0, %c0_i32_1 : i32, i32, i32
  }
  func.func @transform_5(%arg0: i32) -> (i32, i32, i32) {
    %c0_i32 = arith.constant 0 : i32
    %c0_i32_0 = arith.constant 0 : i32
    %c0_i32_1 = arith.constant 0 : i32
    %c0_i32_2 = arith.constant 0 : i32
    return %c0_i32, %c0_i32_0, %c0_i32_1 : i32, i32, i32
  }
  func.func @transform_6(%arg0: i32) -> (i32, i32) {
    %c0_i32 = arith.constant 0 : i32
    %c0_i32_0 = arith.constant 0 : i32
    %c0_i32_1 = arith.constant 0 : i32
    return %c0_i32, %c0_i32_0 : i32, i32
  }
  func.func @transform_7(%arg0: i32) -> (i32, i32) {
    %c0_i32 = arith.constant 0 : i32
    %c0_i32_0 = arith.constant 0 : i32
    %c0_i32_1 = arith.constant 0 : i32
    return %c0_i32, %c0_i32_0 : i32, i32
  }
  func.func @transform_8(%arg0: i32) -> (i32, i32) {
    %c0_i32 = arith.constant 0 : i32
    %c0_i32_0 = arith.constant 0 : i32
    %c0_i32_1 = arith.constant 0 : i32
    return %c0_i32, %c0_i32_0 : i32, i32
  }
  func.func @transform_9(%arg0: i32) -> (i32, i32) {
    %c0_i32 = arith.constant 0 : i32
    %c0_i32_0 = arith.constant 0 : i32
    %c0_i32_1 = arith.constant 0 : i32
    return %c0_i32, %c0_i32_0 : i32, i32
  }
  func.func @transform_10(%arg0: i32) -> (i32, i32) {
    %c0_i32 = arith.constant 0 : i32
    %c0_i32_0 = arith.constant 0 : i32
    %c0_i32_1 = arith.constant 0 : i32
    return %c0_i32, %c0_i32_0 : i32, i32
  }
  func.func @transform_11(%arg0: i32) -> (i32, i32) {
    %c0_i32 = arith.constant 0 : i32
    %c0_i32_0 = arith.constant 0 : i32
    %c0_i32_1 = arith.constant 0 : i32
    return %c0_i32, %c0_i32_0 : i32, i32
  }
  func.func @transform_12(%arg0: i32) -> (i32, i32) {
    %c0_i32 = arith.constant 0 : i32
    %c0_i32_0 = arith.constant 0 : i32
    %c0_i32_1 = arith.constant 0 : i32
    return %c0_i32, %c0_i32_0 : i32, i32
  }
  func.func @transform_13(%arg0: i32) -> (i32, i32) {
    %c0_i32 = arith.constant 0 : i32
    %c0_i32_0 = arith.constant 0 : i32
    %c0_i32_1 = arith.constant 0 : i32
    return %c0_i32, %c0_i32_0 : i32, i32
  }
  func.func @transform_14(%arg0: i32) -> (i32, i32) {
    %c0_i32 = arith.constant 0 : i32
    %c0_i32_0 = arith.constant 0 : i32
    %c0_i32_1 = arith.constant 0 : i32
    return %c0_i32, %c0_i32_0 : i32, i32
  }
  func.func @transform_15(%arg0: i32) -> (i32, i32) {
    %c0_i32 = arith.constant 0 : i32
    %c0_i32_0 = arith.constant 0 : i32
    %c0_i32_1 = arith.constant 0 : i32
    return %c0_i32, %c0_i32_0 : i32, i32
  }
  func.func @transform_16(%arg0: i32) -> (i32, i32) {
    %c0_i32 = arith.constant 0 : i32
    %c0_i32_0 = arith.constant 0 : i32
    %c0_i32_1 = arith.constant 0 : i32
    return %c0_i32, %c0_i32_0 : i32, i32
  }
  func.func @transform_17(%arg0: i32) -> (i32, i32) {
    %c0_i32 = arith.constant 0 : i32
    %c0_i32_0 = arith.constant 0 : i32
    %c0_i32_1 = arith.constant 0 : i32
    return %c0_i32, %c0_i32_0 : i32, i32
  }
  func.func @transform_18(%arg0: i32) -> (i32, i32, i32) {
    %c0_i32 = arith.constant 0 : i32
    %c0_i32_0 = arith.constant 0 : i32
    %c0_i32_1 = arith.constant 0 : i32
    %c0_i32_2 = arith.constant 0 : i32
    return %c0_i32, %c0_i32_0, %c0_i32_1 : i32, i32, i32
  }
  func.func @transform_19(%arg0: i32) -> (i32, i32, i32) {
    %c0_i32 = arith.constant 0 : i32
    %c0_i32_0 = arith.constant 0 : i32
    %c0_i32_1 = arith.constant 0 : i32
    %c0_i32_2 = arith.constant 0 : i32
    return %c0_i32, %c0_i32_0, %c0_i32_1 : i32, i32, i32
  }
  func.func @transform_20(%arg0: i32) -> (i32, i32, i32) {
    %c0_i32 = arith.constant 0 : i32
    %c0_i32_0 = arith.constant 0 : i32
    %c0_i32_1 = arith.constant 0 : i32
    %c0_i32_2 = arith.constant 0 : i32
    return %c0_i32, %c0_i32_0, %c0_i32_1 : i32, i32, i32
  }
  func.func @transform_21(%arg0: i32) -> (i32, i32, i32) {
    %c0_i32 = arith.constant 0 : i32
    %c0_i32_0 = arith.constant 0 : i32
    %c0_i32_1 = arith.constant 0 : i32
    %c0_i32_2 = arith.constant 0 : i32
    return %c0_i32, %c0_i32_0, %c0_i32_1 : i32, i32, i32
  }
  func.func @transform_22(%arg0: i32) -> (i32, i32, i32) {
    %c0_i32 = arith.constant 0 : i32
    %c0_i32_0 = arith.constant 0 : i32
    %c0_i32_1 = arith.constant 0 : i32
    %c0_i32_2 = arith.constant 0 : i32
    return %c0_i32, %c0_i32_0, %c0_i32_1 : i32, i32, i32
  }
  func.func @transform_23(%arg0: i32) -> (i32, i32, i32) {
    %c0_i32 = arith.constant 0 : i32
    %c0_i32_0 = arith.constant 0 : i32
    %c0_i32_1 = arith.constant 0 : i32
    %c0_i32_2 = arith.constant 0 : i32
    return %c0_i32, %c0_i32_0, %c0_i32_1 : i32, i32, i32
  }
  func.func @transform_24(%arg0: i32) -> (i32, i32, i32) {
    %c0_i32 = arith.constant 0 : i32
    %c0_i32_0 = arith.constant 0 : i32
    %c0_i32_1 = arith.constant 0 : i32
    return %arg0, %c0_i32, %c0_i32_0 : i32, i32, i32
  }
}

</mosaic_0001>

<bundles_post_ra>
// kernel: tpu_custom_call.1
= control target key start
LH: loop header
LB: loop body
LE: loop exit
PB: predicated region body
PF: predicated region fallthrough
CT: control target
= control target key end

     0   :  { %s5059_s0 = inlined_call_operand.vmem [shape: f32[2,16,128], index: 0, kind: input, shape index: {}]   ;;  %s5060_s1 = inlined_call_operand.hbm [shape: bf16[2,16,16], index: 1, kind: input, shape index: {}]   ;;  %s5061_s2 = inlined_call_operand.hbm [shape: s32[2,1,16], index: 2, kind: input, shape index: {}]   ;;  %s5062_s3 = inlined_call_operand.vmem [shape: s32[2,16,1], index: 3, kind: input, shape index: {}]   ;;  %s5063_s4 = inlined_call_operand.hbm [shape: bf16[2,32,128], index: 4, kind: input, shape index: {}]   ;;  %s5064_s5 = inlined_call_operand.hbm [shape: f32[2,1,128], index: 5, kind: input, shape index: {}]   ;;  %s5065_s6 = inlined_call_operand.hbm [shape: bf16[32,128], index: 6, kind: input, shape index: {}]   ;;  %s5066_s7 = inlined_call_operand.hbm [shape: bf16[32,128], index: 7, kind: input, shape index: {}]   ;;  %s5067_s8 = inlined_call_operand.hbm [shape: bf16[32,128], index: 8, kind: input, shape index: {}]   ;;  %s5068_s9 = inlined_call_operand.vmem [shape: bf16[128,128], index: 9, kind: input, shape index: {}]   ;;  %s5069_s10 = inlined_call_operand.hbm [shape: bf16[32,128], index: 10, kind: input, shape index: {}]   ;;  %s5070_s11 = inlined_call_operand.hbm [shape: f32[1,128], index: 11, kind: input, shape index: {}]   ;;  %s5071_s12 = inlined_call_operand.hbm [shape: bf16[32,128], index: 12, kind: input, shape index: {}]   ;;  %s5072_s13 = inlined_call_operand.hbm [shape: f32[1,128], index: 13, kind: input, shape index: {}]   ;;  %s5073_s14 = inlined_call_operand.hbm [shape: f32[1,128], index: 14, kind: input, shape index: {}]   ;;  %s5074_s15 = inlined_call_operand.hbm [shape: f32[1,128], index: 15, kind: input, shape index: {}]   ;;  %s5075_s16 = inlined_call_operand.hbm [shape: f32[1,128], index: 16, kind: input, shape index: {}]   ;;  %s5076_s17 = inlined_call_operand.hbm [shape: f32[1,128], index: 17, kind: input, shape index: {}]   ;;  %s5077_s18 = inlined_call_operand.vmem [shape: bf16[2,32,128], index: 18, kind: input, shape index: {}]   ;;  %s5078_s19 = inlined_call_operand.vmem [shape: f32[2,1,128], index: 19, kind: input, shape index: {}]   ;;  %s5079_s20 = inlined_call_operand.hbm [shape: bf16[2,32,128], index: 20, kind: input, shape index: {}]   ;;  %s5080_s21 = inlined_call_operand.vmem [shape: f32[2,1,128], index: 21, kind: input, shape index: {}]   ;;  %s5081_s22 = inlined_call_operand.vmem [shape: f32[2,32,2], index: 22, kind: input, shape index: {}]   ;;  %s5082_s23 = inlined_call_operand.vmem [shape: f32[2,1,2], index: 23, kind: input, shape index: {}]   ;;  %s5083_s24 = inlined_call_operand.hbm [shape: f32[2,2,2], index: 24, kind: output, shape index: {}]  }
   0x1   :  { %5098 = sst [smem:[#allocation42_spill]] %s5059_s0 }
   0x2   :  { %5099 = sst [smem:[#allocation43_spill]] %s5060_s1 }
   0x3   :  { %5100 = sst [smem:[#allocation44_spill]] %s5061_s2 }
   0x4   :  { %5101 = sst [smem:[#allocation45_spill]] %s5062_s3 }
   0x5   :  { %5102 = sst [smem:[#allocation46_spill]] %s5063_s4 }
   0x6   :  { %5103 = sst [smem:[#allocation47_spill]] %s5064_s5 }
   0x7   :  { %5104 = sst [smem:[#allocation48_spill]] %s5065_s6 }
   0x8   :  { %5105 = sst [smem:[#allocation49_spill]] %s5066_s7 }
   0x9   :  { %5106 = sst [smem:[#allocation50_spill]] %s5067_s8 }
   0xa   :  { %5107 = sst [smem:[#allocation51_spill]] %s5069_s10 }
   0xb   :  { %5108 = sst [smem:[#allocation52_spill]] %s5070_s11 }
   0xc   :  { %5109 = sst [smem:[#allocation53_spill]] %s5071_s12 }
   0xd   :  { %5110 = sst [smem:[#allocation54_spill]] %s5072_s13 }
   0xe   :  { %5111 = sst [smem:[#allocation55_spill]] %s5073_s14 }
   0xf   :  { %5112 = sst [smem:[#allocation56_spill]] %s5074_s15 }
  0x10   :  { %5113 = sst [smem:[#allocation57_spill]] %s5075_s16 }
  0x11   :  { %5114 = sst [smem:[#allocation58_spill]] %s5076_s17 }
  0x12   :  { %5115 = sst [smem:[#allocation59_spill]] %s5078_s19 }
  0x13   :  { %5116 = sst [smem:[#allocation60_spill]] %s5079_s20 }
  0x14   :  { %5117 = sst [smem:[#allocation61_spill]] %s5080_s21 }
  0x15   :  { %5118 = sst [smem:[#allocation62_spill]] %s5081_s22 }
  0x16   :  { %5119 = sst [smem:[#allocation63_spill]] %s5082_s23 }
  0x17   :  { %5120 = sst [smem:[#allocation64_spill]] %s5083_s24 }
  0x18   :  { %29 = vsyncpa [#allocation4], 0 }
  0x19   :  { %31 = vsyncpa [#allocation4 + $0x1], 0 }
  0x1a   :  { %32 = vsyncpa [#allocation7], 0 }
  0x1b   :  { %34 = vsyncpa [#allocation7 + $0x1], 0 }
  0x1c   :  { %35 = vsyncpa [#allocation10], 0 }
  0x1d   :  { %36 = vsyncpa [#allocation13], 0 }
  0x1e   :  { %37 = vsyncpa [#allocation16], 0 }
  0x1f   :  { %38 = vsyncpa [#allocation19], 0 }
  0x20   :  { %39 = vsyncpa [#allocation22], 0 }
  0x21   :  { %40 = vsyncpa [#allocation25], 0 }
  0x22   :  { %41 = vsyncpa [#allocation28], 0 }
  0x23   :  { %42 = vsyncpa [#allocation5], 0 }
  0x24   :  { %44 = vsyncpa [#allocation5 + $0x1], 0  ;;  %s4396_s5 = smov 0   ;;  %s4398_s26 = smov 0  }
  0x25   :  { %s4400_s27 = smov 0   ;;  %s4402_s28 = smov 0  }
  0x26 LB: > { %s4243_s6 = smov [#allocation8]   ;;  %s4417_s29 = sadd.s32 4294967295, %s4241_s28   ;;  %s4241_s28 = sphi %s4402_s28, %s5182_s28   ;;  %s4237_s27 = sphi %s4400_s27, %s5181_s27   ;;  %s4233_s26 = sphi %s4398_s26, %s5180_s26   ;;  %s4229_s5 = sphi %s4396_s5, %s5179_s5  }
  0x27   : > { %s617_s2 = sshll.u32 %s4243_s6, 4  ;;  %p3052_p0 = scmp.ge.s32.totalorder %s4241_s28, 1  ;;  %s618_s2 = int_to_ptr.vmem [resolvable:$true] %s617_s2 }
  0x28   : > { %p5091_p1 = scmp.eq.s32.totalorder %s4417_s29, 0  ;;  %p605_p2 = scmp.lt.s32.totalorder %s4241_s28, 3 }
  0x29   : > { %s4244_s7 = smov [#allocation9]   ;;  %s4245_s25 = smov [#allocation12]  }
  0x2a   : > { %p4422_p3 = pnand %p3052_p0, %p605_p2  ;;  %s630_s30 = sshll.u32 %s4244_s7, 4  ;;  %s4435_s30 = int_to_ptr.vmem [resolvable:$true] %s630_s30 }
  0x2b   : > { %s4437_s8 = sshll.u32 %s4245_s25, 4  ;;  %s3732_s1 = scalar_lea.vmem %s618_s2, 512  ;;  %s657_s8 = int_to_ptr.vmem [resolvable:$true] %s4437_s8 }
  0x2c   : > { %s5121_s0 = scalar_select %p4422_p3, 1, 0 }
  0x2d   : > { %p3505_p5 = pneg %p4422_p3  ;;  %p3733_p8 = scmp.ne.s32.totalorder %s618_s2, %s3732_s1 }
  0x2e   : > { %p3740_p11 = scmp.lt.s32.totalorder %s618_s2, %s618_s2  ;;  %p3741_p12 = scmp.lt.s32.totalorder %s3732_s1, %s3732_s1 }
  0x2f   : > { %p4431_p6 = pnand %p3505_p5, %p5091_p1 }
  0x30   : > { %p3742_p13 = por %p3741_p12, %p3740_p11 }
  0x31   : > { %p4441_p7 = pneg %p4431_p6 }
  0x33   : > { %p3735_p9 = pnand %p3733_p8, %p4441_p7 }
  0x35   : > { %p3736_p10 = pneg %p3735_p9 }
  0x37   : > { %p3743_p0 = pnand %p3742_p13, %p3736_p10 }
  0x39   : > { %3746 = shalt.err (!%p3743_p0)
}
  0x3a   : > { %s5092_s6 = smov 64   ;;  %s5093_s7 = smov 4  }
  0x3b   : > { %s5124_s23 = sld [smem:[#allocation46_spill]]  ;;  %s3758_s21 = scalar_lea.vmem %s4435_s30, 32 }
  0x3c   : > { %p3759_p2 = scmp.ne.s32.totalorder %s4435_s30, %s3758_s21  ;;  %p3766_p9 = scmp.lt.s32.totalorder %s4435_s30, %s4435_s30 }
  0x3d   : > { %p3767_p10 = scmp.lt.s32.totalorder %s3758_s21, %s3758_s21 }
  0x3e   : > { %p3761_p5 = pnand %p3759_p2, %p4441_p7 }
  0x3f   : > { %p3768_p11 = por %p3767_p10, %p3766_p9 }
  0x40   : > { %p3762_p8 = pneg %p3761_p5 }
  0x41   : > { %3508 = dma.hbm_to_vmem [thread:$0]  (!%p4431_p6), %s5124_s23, 512, %s618_s2, [#allocation7], %s5092_s6, %s5092_s6, %s5093_s7  }
  0x42   : > { %p3769_p12 = pnand %p3768_p11, %p3762_p8 }
  0x44   : > { %3772 = shalt.err (!%p3769_p12)
}
  0x45   : > { %s4248_s1 = smov 16   ;;  %s4249_s22 = smov 1  }
  0x46   : > { %s5125_s2 = sld [smem:[#allocation47_spill]]  ;;  %s3784_s25 = scalar_lea.vmem %s657_s8, 256 }
  0x47   : > { %p3785_p13 = scmp.ne.s32.totalorder %s657_s8, %s3784_s25  ;;  %p3792_p5 = scmp.lt.s32.totalorder %s657_s8, %s657_s8 }
  0x48   : > { %p3793_p8 = scmp.lt.s32.totalorder %s3784_s25, %s3784_s25 }
  0x49   : > { %p3787_p0 = pnand %p3785_p13, %p4441_p7 }
  0x4a   : > { %p3794_p9 = por %p3793_p8, %p3792_p5 }
  0x4b   : > { %p3788_p2 = pneg %p3787_p0 }
  0x4c   : > { %3511 = dma.hbm_to_vmem [thread:$0]  (!%p4431_p6), %s5125_s2, 32, %s4435_s30, [#allocation10], %s4248_s1, %s4248_s1, %s4249_s22  }
  0x4d   : > { %p3795_p10 = pnand %p3794_p9, %p3788_p2 }
  0x4f   : > { %3798 = shalt.err (!%p3795_p10)
}
  0x50   : > { %s5126_s24 = sld [smem:[#allocation49_spill]]  ;;  %s4250_s22 = smov [#allocation15]  }
  0x51   : > { %s685_s30 = sshll.u32 %s4250_s22, 4  ;;  %s4251_s1 = smov [#allocation18]   ;;  %s686_s30 = int_to_ptr.vmem [resolvable:$true] %s685_s30 }
  0x52   : > { %s709_s23 = sshll.u32 %s4251_s1, 4  ;;  %s3810_s2 = scalar_lea.vmem %s686_s30, 256  ;;  %s710_s23 = int_to_ptr.vmem [resolvable:$true] %s709_s23 }
  0x53   : > { %p3811_p11 = scmp.ne.s32.totalorder %s686_s30, %s3810_s2  ;;  %p3818_p0 = scmp.lt.s32.totalorder %s686_s30, %s686_s30 }
  0x54   : > { %p3819_p2 = scmp.lt.s32.totalorder %s3810_s2, %s3810_s2 }
  0x55   : > { %p3813_p12 = pnand %p3811_p11, %p4441_p7 }
  0x56   : > { %3517 = dma.hbm_to_vmem [thread:$0]  (!%p4431_p6), %s5126_s24, 256, %s657_s8, [#allocation13], %s5092_s6, %s5092_s6, %s5093_s7  }
  0x57   : > { %p3814_p13 = pneg %p3813_p12  ;;  %p3820_p5 = por %p3819_p2, %p3818_p0 }
  0x59   : > { %p3821_p8 = pnand %p3820_p5, %p3814_p13 }
  0x5b   : > { %3824 = shalt.err (!%p3821_p8)
}
  0x5c   : > { %s5127_s10 = sld [smem:[#allocation51_spill]]  ;;  %s3836_s25 = scalar_lea.vmem %s710_s23, 256 }
  0x5d   : > { %p3837_p9 = scmp.ne.s32.totalorder %s710_s23, %s3836_s25  ;;  %p3844_p12 = scmp.lt.s32.totalorder %s710_s23, %s710_s23 }
  0x5e   : > { %p3845_p0 = scmp.lt.s32.totalorder %s3836_s25, %s3836_s25 }
  0x5f   : > { %p3839_p10 = pnand %p3837_p9, %p4441_p7 }
  0x60   : > { %p3846_p13 = por %p3845_p0, %p3844_p12 }
  0x61   : > { %p3840_p11 = pneg %p3839_p10 }
  0x62   : > { %3523 = dma.hbm_to_vmem [thread:$0]  (!%p4431_p6), %s5127_s10, 256, %s686_s30, [#allocation16], %s5092_s6, %s5092_s6, %s5093_s7  }
  0x63   : > { %p3847_p2 = pnand %p3846_p13, %p3840_p11 }
  0x65   : > { %3850 = shalt.err (!%p3847_p2)
}
  0x66   : > { %s5128_s12 = sld [smem:[#allocation53_spill]]  ;;  %s4252_s22 = smov [#allocation21]  }
  0x67   : > { %s734_s30 = sshll.u32 %s4252_s22, 4  ;;  %s4253_s1 = smov [#allocation24]   ;;  %s735_s30 = int_to_ptr.vmem [resolvable:$true] %s734_s30 }
  0x68   : > { %s756_s2 = sshll.u32 %s4253_s1, 4  ;;  %s3862_s19 = scalar_lea.vmem %s735_s30, 16  ;;  %s757_s2 = int_to_ptr.vmem [resolvable:$true] %s756_s2 }
  0x69   : > { %p3863_p5 = scmp.ne.s32.totalorder %s735_s30, %s3862_s19  ;;  %s3869_s8 = scalar_lea.vmem %s735_s30, 32 }
  0x6a   : > { %p3870_p10 = scmp.lt.s32.totalorder %s735_s30, %s735_s30  ;;  %p3871_p11 = scmp.lt.s32.totalorder %s3869_s8, %s3862_s19 }
  0x6b   : > { %p3865_p8 = pnand %p3863_p5, %p4441_p7 }
  0x6c   : > { %3529 = dma.hbm_to_vmem [thread:$0]  (!%p4431_p6), %s5128_s12, 256, %s710_s23, [#allocation19], %s5092_s6, %s5092_s6, %s5093_s7  }
  0x6d   : > { %p3866_p9 = pneg %p3865_p8  ;;  %p3872_p12 = por %p3871_p11, %p3870_p10 }
  0x6f   : > { %p3873_p0 = pnand %p3872_p12, %p3866_p9 }
  0x71   : > { %3876 = shalt.err (!%p3873_p0)
}
  0x72   : > { %s5129_s14 = sld [smem:[#allocation55_spill]]  ;;  %s3888_s21 = scalar_lea.vmem %s757_s2, 16 }
  0x73   : > { %p3889_p13 = scmp.ne.s32.totalorder %s757_s2, %s3888_s21  ;;  %s3895_s24 = scalar_lea.vmem %s757_s2, 32 }
  0x74   : > { %p3896_p8 = scmp.lt.s32.totalorder %s757_s2, %s757_s2  ;;  %p3897_p4 = scmp.lt.s32.totalorder %s3895_s24, %s3888_s21 }
  0x75   : > { %p3891_p2 = pnand %p3889_p13, %p4441_p7 }
  0x76   : > { %p3898_p1 = por %p3897_p4, %p3896_p8 }
  0x77   : > { %p3892_p5 = pneg %p3891_p2 }
  0x78   : > { %3535 = dma.hbm_to_vmem [thread:$0]  (!%p4431_p6), %s5129_s14, 16, %s735_s30, [#allocation22]  }
  0x79   : > { %p3899_p10 = pnand %p3898_p1, %p3892_p5 }
  0x7b   : > { %3902 = shalt.err (!%p3899_p10)
}
  0x7c   : > { %s5130_s16 = sld [smem:[#allocation57_spill]]  ;;  %s4254_s30 = smov [#allocation11]  }
  0x7d   : > { %s643_s19 = sshll.u32 %s4254_s30, 4  ;;  %s4255_s8 = smov [#allocation14]   ;;  %s644_s19 = int_to_ptr.vmem [resolvable:$true] %s643_s19 }
  0x7e   : > { %s669_s25 = sshll.u32 %s4255_s8, 4  ;;  %s3914_s23 = scalar_lea.vmem %s644_s19, 256  ;;  %s670_s25 = int_to_ptr.vmem [resolvable:$true] %s669_s25 }
  0x7f   : > { %p3915_p9 = scmp.ne.s32.totalorder %s644_s19, %s3914_s23  ;;  %p3922_p4 = scmp.lt.s32.totalorder %s644_s19, %s644_s19 }
  0x80   : > { %p3923_p1 = scmp.lt.s32.totalorder %s3914_s23, %s3914_s23 }
  0x81   : > { %p3917_p11 = pnand %p3915_p9, %p4441_p7 }
  0x82   : > { %3541 = dma.hbm_to_vmem [thread:$0]  (!%p4431_p6), %s5130_s16, 16, %s757_s2, [#allocation25]  }
  0x83   : > { %p3918_p12 = pneg %p3917_p11  ;;  %p3924_p0 = por %p3923_p1, %p3922_p4 }
  0x85   : > { %p3925_p13 = pnand %p3924_p0, %p3918_p12 }
  0x87   : > { %3928 = shalt.err (!%p3925_p13)
}
  0x88   : > { %s5131_s24 = sld [smem:[#allocation48_spill]]  ;;  %s3940_s22 = scalar_lea.vmem %s670_s25, 256 }
  0x89   : > { %p3941_p2 = scmp.ne.s32.totalorder %s670_s25, %s3940_s22  ;;  %p3948_p10 = scmp.lt.s32.totalorder %s670_s25, %s670_s25 }
  0x8a   : > { %p3949_p9 = scmp.lt.s32.totalorder %s3940_s22, %s3940_s22 }
  0x8b   : > { %p3943_p5 = pnand %p3941_p2, %p4441_p7 }
  0x8c   : > { %p3950_p11 = por %p3949_p9, %p3948_p10 }
  0x8d   : > { %p3944_p8 = pneg %p3943_p5 }
  0x8e   : > { %3514 = dma.hbm_to_vmem [thread:$0]  (!%p4431_p6), %s5131_s24, 256, %s644_s19, [#allocation10], %s5092_s6, %s5092_s6, %s5093_s7  }
  0x8f   : > { %p3951_p12 = pnand %p3950_p11, %p3944_p8 }
  0x91   : > { %3954 = shalt.err (!%p3951_p12)
}
  0x92   : > { %s5132_s8 = sld [smem:[#allocation50_spill]]  ;;  %s4256_s19 = smov [#allocation17]  }
  0x93   : > { %s699_s23 = sshll.u32 %s4256_s19, 4  ;;  %s4257_s2 = smov [#allocation20]   ;;  %s700_s23 = int_to_ptr.vmem [resolvable:$true] %s699_s23 }
  0x94   : > { %s723_s21 = sshll.u32 %s4257_s2, 4  ;;  %s3966_s24 = scalar_lea.vmem %s700_s23, 16  ;;  %s724_s21 = int_to_ptr.vmem [resolvable:$true] %s723_s21 }
  0x95   : > { %p3967_p4 = scmp.ne.s32.totalorder %s700_s23, %s3966_s24  ;;  %s3973_s22 = scalar_lea.vmem %s700_s23, 32 }
  0x96   : > { %p3974_p13 = scmp.lt.s32.totalorder %s700_s23, %s700_s23  ;;  %p3975_p2 = scmp.lt.s32.totalorder %s3973_s22, %s3966_s24 }
  0x97   : > { %p3969_p1 = pnand %p3967_p4, %p4441_p7 }
  0x98   : > { %3520 = dma.hbm_to_vmem [thread:$0]  (!%p4431_p6), %s5132_s8, 256, %s670_s25, [#allocation13], %s5092_s6, %s5092_s6, %s5093_s7  }
  0x99   : > { %p3970_p0 = pneg %p3969_p1  ;;  %p3976_p5 = por %p3975_p2, %p3974_p13 }
  0x9b   : > { %p3977_p8 = pnand %p3976_p5, %p3970_p0 }
  0x9d   : > { %3980 = shalt.err (!%p3977_p8)
}
  0x9e   : > { %s5133_s11 = sld [smem:[#allocation52_spill]]  ;;  %s3992_s30 = scalar_lea.vmem %s724_s21, 16 }
  0x9f   : > { %p3993_p10 = scmp.ne.s32.totalorder %s724_s21, %s3992_s30  ;;  %s3999_s8 = scalar_lea.vmem %s724_s21, 32 }
  0xa0   : > { %p4000_p12 = scmp.lt.s32.totalorder %s724_s21, %s724_s21  ;;  %p4001_p4 = scmp.lt.s32.totalorder %s3999_s8, %s3992_s30 }
  0xa1   : > { %p3995_p9 = pnand %p3993_p10, %p4441_p7 }
  0xa2   : > { %p4002_p1 = por %p4001_p4, %p4000_p12 }
  0xa3   : > { %p3996_p11 = pneg %p3995_p9 }
  0xa4   : > { %3526 = dma.hbm_to_vmem [thread:$0]  (!%p4431_p6), %s5133_s11, 16, %s700_s23, [#allocation16]  }
  0xa5   : > { %p4003_p13 = pnand %p4002_p1, %p3996_p11 }
  0xa7   : > { %4006 = shalt.err (!%p4003_p13)
}
  0xa8   : > { %s5134_s13 = sld [smem:[#allocation54_spill]]  ;;  %s4258_s23 = smov [#allocation23]  }
  0xa9   : > { %s745_s24 = sshll.u32 %s4258_s23, 4  ;;  %s4259_s22 = smov [#allocation26]   ;;  %s746_s24 = int_to_ptr.vmem [resolvable:$true] %s745_s24 }
  0xaa   : > { %s767_s1 = sshll.u32 %s4259_s22, 4  ;;  %s4018_s25 = scalar_lea.vmem %s746_s24, 16  ;;  %s768_s1 = int_to_ptr.vmem [resolvable:$true] %s767_s1 }
  0xab   : > { %p4019_p0 = scmp.ne.s32.totalorder %s746_s24, %s4018_s25  ;;  %s4025_s30 = scalar_lea.vmem %s746_s24, 32 }
  0xac   : > { %p4026_p8 = scmp.lt.s32.totalorder %s746_s24, %s746_s24  ;;  %p4027_p10 = scmp.lt.s32.totalorder %s4025_s30, %s4018_s25 }
  0xad   : > { %p4021_p2 = pnand %p4019_p0, %p4441_p7 }
  0xae   : > { %3532 = dma.hbm_to_vmem [thread:$0]  (!%p4431_p6), %s5134_s13, 16, %s724_s21, [#allocation19]  }
  0xaf   : > { %p4022_p5 = pneg %p4021_p2  ;;  %p4028_p9 = por %p4027_p10, %p4026_p8 }
  0xb1   : > { %p4029_p11 = pnand %p4028_p9, %p4022_p5 }
  0xb3   : > { %4032 = shalt.err (!%p4029_p11)
}
  0xb4   : > { %s5135_s15 = sld [smem:[#allocation56_spill]]  ;;  %s4044_s19 = scalar_lea.vmem %s768_s1, 16 }
  0xb5   : > { %p4045_p12 = scmp.ne.s32.totalorder %s768_s1, %s4044_s19  ;;  %s4051_s2 = scalar_lea.vmem %s768_s1, 32 }
  0xb6   : > { %p4052_p13 = scmp.lt.s32.totalorder %s768_s1, %s768_s1  ;;  %p4053_p0 = scmp.lt.s32.totalorder %s4051_s2, %s4044_s19 }
  0xb7   : > { %p4047_p4 = pnand %p4045_p12, %p4441_p7 }
  0xb8   : > { %p4054_p2 = por %p4053_p0, %p4052_p13 }
  0xb9   : > { %p4048_p1 = pneg %p4047_p4 }
  0xba   : > { %3538 = dma.hbm_to_vmem [thread:$0]  (!%p4431_p6), %s5135_s15, 16, %s746_s24, [#allocation22]  }
  0xbb   : > { %p4055_p8 = pnand %p4054_p2, %p4048_p1 }
  0xbd   : > { %4058 = shalt.err (!%p4055_p8)
}
  0xbe   : > { %s5136_s17 = sld [smem:[#allocation58_spill]]  ;;  %s4260_s24 = smov [#allocation27]  }
  0xbf   : > { %s783_s25 = sshll.u32 %s4260_s24, 4  ;;  %s784_s25 = int_to_ptr.vmem [resolvable:$true] %s783_s25 }
  0xc0   : > { %s4070_s30 = scalar_lea.vmem %s784_s25, 512  ;;  %p4078_p11 = scmp.lt.s32.totalorder %s784_s25, %s784_s25 }
  0xc1   : > { %p4071_p5 = scmp.ne.s32.totalorder %s784_s25, %s4070_s30  ;;  %p4079_p12 = scmp.lt.s32.totalorder %s4070_s30, %s4070_s30 }
  0xc3   : > { %p4073_p10 = pnand %p4071_p5, %p4441_p7  ;;  %p4080_p4 = por %p4079_p12, %p4078_p11 }
  0xc4   : > { %3544 = dma.hbm_to_vmem [thread:$0]  (!%p4431_p6), %s5136_s17, 16, %s768_s1, [#allocation25]  }
  0xc5   : > { %p4074_p9 = pneg %p4073_p10 }
  0xc7   : > { %p4081_p1 = pnand %p4080_p4, %p4074_p9 }
  0xc9   : > { %4084 = shalt.err (!%p4081_p1)
}
  0xca   : > { %s5137_s20 = sld [smem:[#allocation60_spill]]  ;;  %s3051_s3 = sadd.s32 4294967294, %s4241_s28  }
  0xcb   : > { %s4572_s4 = sadd.s32 1, %s4241_s28   ;;  %s83_s19 = sadd.s32 1, %s4237_s27 }
  0xcc   : > { %s80_s21 = ssub.s32 %s4241_s28, %s4572_s4  ;;  %p90_p13 = scmp.ne.s32.totalorder %s4237_s27, %s4233_s26 }
  0xcd   : > { %p81_p7 = scmp.eq.s32.totalorder %s80_s21, 0  ;;  %p91_p0 = scmp.eq.s32.totalorder %s4241_s28, 0 }
  0xce   : > { %p96_p2 = scmp.ne.s32.totalorder %s4233_s26, %s4229_s5  ;;  %p5140_p5 = scmp.eq.s32.totalorder %s4417_s29, 0 }
  0xcf   : > { %s4583_s2 = scalar_select %p81_p7, %s4237_s27, %s83_s19  }
  0xd0   : > { %3547 = dma.hbm_to_vmem [thread:$0]  (!%p4431_p6), %s5137_s20, 512, %s784_s25, [#allocation28], %s5092_s6, %s5092_s6, %s5093_s7  }
  0xd1   : > { %5138 = sst [smem:[#allocation41_spill]] %s4583_s2  ;;  %p4585_p8 = por %p91_p0, %p90_p13 }
  0xd2   : > { %p4591_p6 = por %p5140_p5, %p96_p2  ;;  %p592_p10 = scmp.eq.s32.totalorder %s4417_s29, 1 }
  0xd3   : > { %p598_p9 = scmp.eq.s32.totalorder %s3051_s3, 1  ;;  %p3573_p11 = scmp.lt.s32.totalorder %s4241_s28, 2 }
  0xd4   : > { %s5141_s22 = scalar_select %p4591_p6, 1, 0 }
  0xd5   : > { %s4598_s24 = sand.u32 1, %s4237_s27   ;;  %p4600_p12 = por %p592_p10, %p90_p13 }
  0xd6   : > { %p4604_p4 = por %p598_p9, %p96_p2  ;;  %s3068_s8 = sshll.u32 %s4598_s24, 3 }
  0xd7   : > { %s5142_s25 = scalar_select %p4600_p12, 1, 0 }
  0xd8   : > { %s5143_s30 = scalar_select %p4604_p4, 1, 0 }
  0xd9   : > { %s3180_s1 = sshll.u32 %s4241_s28, 7  ;;  %s5144_s6 = sld [smem:[#allocation43_spill]] }
  0xda   : > { %s818_s3 = scalar_lea.vmem [#allocation3], %s3068_s8  ;;  %p4619_p1 = pnand %p3573_p11, %p4585_p8 }
  0xdb   : > { %s825_s10 = sshll.u32 %s818_s3, 4  ;;  %s815_s13 = scalar_lea.sflag [#allocation4], %s4598_s24  ;;  %s4615_s10 = int_to_ptr.vmem [resolvable:$true] %s825_s10 }
  0xdc   : > { %p4087_p13 = pneg %p4619_p1 }
  0xdf   : > { %s4613_s7 = scalar_lea.hbm %s5144_s6, %s3180_s1  ;;  %s4090_s23 = scalar_lea.hbm %s5144_s6, 256 }
  0xe0   : > { %s4085_s14 = scalar_lea.hbm %s4613_s7, 128  ;;  %p4091_p8 = scmp.lt.s32.totalorder %s4613_s7, %s5144_s6 }
  0xe1   : > { %p4086_p7 = scmp.ne.s32.totalorder %s4613_s7, %s4085_s14  ;;  %p4092_p5 = scmp.lt.s32.totalorder %s4090_s23, %s4085_s14 }
  0xe3   : > { %p4088_p0 = pnand %p4087_p13, %p4086_p7  ;;  %p4093_p10 = por %p4092_p5, %p4091_p8 }
  0xe5   : > { %p4089_p2 = pneg %p4088_p0 }
  0xe7   : > { %p4094_p9 = pnand %p4093_p10, %p4089_p2 }
  0xe9   : > { %4097 = shalt.err (!%p4094_p9)
}
  0xea   : > { %s4098_s3 = scalar_lea.vmem %s4615_s10, 128  ;;  %s4261_s8 = smov [#allocation3]  }
  0xeb   : > { %p4099_p11 = scmp.ne.s32.totalorder %s4615_s10, %s4098_s3  ;;  %s4103_s1 = sshll.u32 %s4261_s8, 4  ;;  %s4104_s1 = int_to_ptr.vmem [resolvable:$false] %s4103_s1 }
  0xec   : > { %s4105_s12 = scalar_lea.vmem %s4104_s1, 256  ;;  %p4106_p4 = scmp.lt.s32.totalorder %s4615_s10, %s4104_s1 }
  0xed   : > { %p4101_p7 = pnand %p4099_p11, %p4087_p13  ;;  %p4107_p12 = scmp.lt.s32.totalorder %s4105_s12, %s4098_s3 }
  0xef   : > { %p4102_p0 = pneg %p4101_p7  ;;  %p4108_p6 = por %p4107_p12, %p4106_p4 }
  0xf1   : > { %p4109_p8 = pnand %p4108_p6, %p4102_p0 }
  0xf3   : > { %4112 = shalt.err (!%p4109_p8)
}
  0xf4   : > { %s5146_s14 = smov 4   ;;  %s5147_s23 = smov 64  }
  0xf5   : > { %3551 = dma.hbm_to_vmem [thread:$0]  (!%p4619_p1), %s4613_s7, 128, %s4615_s10, %s815_s13, %s5147_s23, %s5147_s23, %s5146_s14  }
  0xf6   : > { %s3071_s21 = sshll.u32 %s4241_s28, 4  ;;  %s838_s19 = scalar_lea.vmem [#allocation6], %s4598_s24 }
  0xf7   : > { %s845_s12 = sshll.u32 %s838_s19, 4  ;;  %s5148_s1 = sld [smem:[#allocation44_spill]]  ;;  %s846_s12 = int_to_ptr.vmem [resolvable:$true] %s845_s12 }
  0xf8   : > { %s5149_s15 = sand.u32 1, %s4241_s28  }
  0xf9   : > { %s836_s16 = scalar_lea.sflag [#allocation7], %s5149_s15 }
  0xfd   : > { %s843_s6 = scalar_lea.hbm %s5148_s1, %s3071_s21  ;;  %s4118_s10 = scalar_lea.hbm %s5148_s1, 32 }
  0xfe   : > { %s4113_s17 = scalar_lea.hbm %s843_s6, 16  ;;  %p4119_p2 = scmp.lt.s32.totalorder %s843_s6, %s5148_s1 }
  0xff   : > { %p4114_p6 = scmp.ne.s32.totalorder %s843_s6, %s4113_s17  ;;  %p4120_p5 = scmp.lt.s32.totalorder %s4118_s10, %s4113_s17 }
 0x101   : > { %p4116_p12 = pnand %p4114_p6, %p4087_p13  ;;  %p4121_p10 = por %p4120_p5, %p4119_p2 }
 0x103   : > { %p4117_p4 = pneg %p4116_p12 }
 0x105   : > { %p4122_p9 = pnand %p4121_p10, %p4117_p4 }
 0x107   : > { %4125 = shalt.err (!%p4122_p9)
}
 0x108   : > { %s4126_s24 = scalar_lea.vmem %s846_s12, 16  ;;  %s4262_s15 = smov [#allocation6]  }
 0x109   : > { %p4127_p11 = scmp.ne.s32.totalorder %s846_s12, %s4126_s24  ;;  %s4131_s14 = sshll.u32 %s4262_s15, 4  ;;  %s4132_s14 = int_to_ptr.vmem [resolvable:$false] %s4131_s14 }
 0x10a   : > { %s4133_s20 = scalar_lea.vmem %s4132_s14, 32  ;;  %p4134_p8 = scmp.lt.s32.totalorder %s846_s12, %s4132_s14 }
 0x10b   : > { %p4129_p7 = pnand %p4127_p11, %p4087_p13  ;;  %p4135_p6 = scmp.lt.s32.totalorder %s4133_s20, %s4126_s24 }
 0x10d   : > { %p4130_p0 = pneg %p4129_p7  ;;  %p4136_p12 = por %p4135_p6, %p4134_p8 }
 0x10f   : > { %p4137_p3 = pnand %p4136_p12, %p4130_p0 }
 0x111   : > { %4140 = shalt.err (!%p4137_p3)
}
 0x112   : > { %3554 = dma.hbm_to_vmem [thread:$0]  (!%p4619_p1), %s843_s6, 16, %s846_s12, %s836_s16  }
 0x113   : > { %p5150_p4 = scmp.ne.s32.totalorder %s5121_s0, 0 }
 0x114   : > { %s4678_s17 = sand.u32 (!%p5150_p4), 1, %s4233_s26   ;;  %p5151_p13 = scmp.ne.s32.totalorder (!%p5150_p4), %s5141_s22, 0 }
 0x115   : > { %862 = sbr.rel (%p5150_p4) target bundleno = 4599 (0x11f7), region = 116  ;;  %s3073_s2 = sshll.u32 (!%p5150_p4), %s4678_s17, 3 }
 0x116   : > { %s865_s23 = scalar_lea.sflag (!%p5150_p4), [#allocation4], %s4678_s17  ;;  %s4682_s21 = scalar_lea.vmem (!%p5150_p4), [#allocation3], %s3073_s2 }
 0x11a   : > { %4184 = dma.done.wait (%p5151_p13), %s865_s23, 128  }
 0x11b   : > { %4186 = vsyncadd (%p5151_p13), %s865_s23, 4294967168  ;;  %s873_s11 = sand.u32 1, %s4417_s29   ;;  %s876_s0 = scalar_lea.vmem [#allocation6], %s4678_s17 }
 0x11c   : > { %s874_s16 = scalar_lea.sflag [#allocation7], %s873_s11 }
 0x11d   : > { %4188 = dma.done.wait (%p5151_p13), %s874_s16, 16  }
 0x11e   : > { %4190 = vsyncadd (%p5151_p13), %s874_s16, 4294967280  ;;  %p5152_p3 = scmp.eq.s32.totalorder %s4417_s29, 0 }
 0x120   : > { %4192 = dma.done.wait (%p5152_p3), [#allocation7], 512   ;;  %p5153_p1 = pmov %p5152_p3 }
 0x122   : > { %4194 = vsyncadd (%p5153_p1), [#allocation7], 4294966784  ;;  %p5154_p2 = pmov %p5153_p1 }
 0x123   : > { %p5155_p5 = pmov %p5153_p1 }
 0x124   : > { %4196 = dma.done.wait (%p5154_p2), [#allocation10], 288  }
 0x125   : > { %4198 = vsyncadd (%p5155_p5), [#allocation10], 4294967008  ;;  %p5156_p10 = pmov %p5153_p1 }
 0x126   : > { %p5157_p9 = pmov %p5153_p1 }
 0x127   : > { %4200 = dma.done.wait (%p5156_p10), [#allocation13], 512  }
 0x128   : > { %4202 = vsyncadd (%p5157_p9), [#allocation13], 4294966784  ;;  %p5158_p11 = pmov %p5153_p1 }
 0x129   : > { %p5159_p7 = pmov %p5153_p1 }
 0x12a   : > { %4204 = dma.done.wait (%p5158_p11), [#allocation16], 272  }
 0x12b   : > { %4206 = vsyncadd (%p5159_p7), [#allocation16], 4294967024  ;;  %p5160_p0 = pmov %p5153_p1 }
 0x12d   : > { %4208 = dma.done.wait (%p5160_p0), [#allocation19], 272   ;;  %p5161_p8 = pmov %p5160_p0 }
 0x12e   : > { %p5162_p6 = pmov %p5160_p0 }
 0x12f   : > { %4210 = vsyncadd (%p5161_p8), [#allocation19], 4294967024 }
 0x130   : > { %4212 = dma.done.wait (%p5162_p6), [#allocation22], 32   ;;  %p5163_p12 = pmov %p5160_p0 }
 0x131   : > { %p5164_p4 = pmov %p5160_p0 }
 0x132   : > { %4214 = vsyncadd (%p5163_p12), [#allocation22], 4294967264 }
 0x133   : > { %4216 = dma.done.wait (%p5164_p4), [#allocation25], 32   ;;  %p5165_p13 = pmov %p5160_p0 }
 0x134   : > { %p5166_p3 = pmov %p5160_p0 }
 0x135   : > { %4218 = vsyncadd (%p5165_p13), [#allocation25], 4294967264 }
 0x136   : > { %4220 = dma.done.wait (%p5166_p3), [#allocation28], 512   ;;  %p5167_p1 = pmov %p5160_p0 }
 0x137   : > { %p1011_p2 = scmp.lt.s32.totalorder %s4417_s29, 1  ;;  %v4263_v0 = vmov 0.0   ;;  %vm4264_vm0 = vmmov 0   ;;  %s5168_s3 = sld [smem:[#allocation42_spill]]  ;;  %v3648_v4 = vld [vmem:[%s4682_s21] sm:$0xff]   ;;  %vm1040_vm1 = vcmask 130048  }
 0x138   : > { %4222 = vsyncadd (%p5167_p1), [#allocation28], 4294966784  ;;  %3253 = vmatprep.subr.bf16.mxu0 %v4263_v0  ;;  %3255 = vmatprep.mubr.msk.bf16.mxu0 %vm4264_vm0, %v4263_v0  ;;  %v3649_v5 = vld [vmem:[#allocation8 + $0x8] sm:$0xff]   ;;  %v3650_v6 = vld [vmem:[#allocation8] sm:$0xff]   ;;  %vm1111_vm2 = vcmask 261120   ;;  %v4265_v51 = vmov 0  }
 0x139   : > { %s4731_s6 = scalar_select %p1011_p2, %s4417_s29, 1  ;;  %3259 = vmatprep.subr.bf16.mxu1 %v4263_v0  ;;  %3263 = vmatprep.mubr.msk.bf16.mxu1 %vm4264_vm0, %v4263_v0  ;;  %v3096_v14 = vld [vmem:[#allocation9] ss:$0 sm:$0xff]  ;;  %v3651_v26 = vld [vmem:[#allocation8 + $0x18] sm:$0xff]   ;;  %v3652_v27 = vld [vmem:[#allocation8 + $0x10] sm:$0xff]   ;;  %vm1724_vm5 = vcmask 523520  }
 0x13a   : > { %3260 = vmatpush3.bf16.msra.mxu1 %v3649_v5  ;;  %v3653_v35 = vld [vmem:[#allocation11 + $0x8] sm:$0xff]   ;;  %v3654_v36 = vld [vmem:[#allocation12 + $0x8] sm:$0xff]   ;;  %v3655_v37 = vld [vmem:[#allocation11] sm:$0xff]   ;;  %3646 = vset.pattern.permute.xlu0 %v4265_v51  ;;  %s4266_s10 = smov 64   ;;  %s4267_s13 = smov 96   ;;  %vm1860_vm6 = vcmask 785920  }
 0x13b   : > { %s3181_s22 = sshll.u32 %s4731_s6, 4  ;;  %3261 = vmatprep.subr.bf16.mxu1 %v4263_v0  ;;  %v3656_v38 = vld [vmem:[#allocation12] sm:$0xff]   ;;  %v3101_v39 = vld [vmem:[#allocation9 + $0x1] ss:$0 sm:$0xff]  ;;  %v3657_v48 = vld [vmem:[#allocation14 + $0x8] sm:$0xff]   ;;  %3647 = vset.pattern.permute.xlu1 %v4265_v51  ;;  %s5169_s15 = sld [smem:[#allocation45_spill]] }
 0x13c   : > { %v3658_v50 = vld [vmem:[#allocation14] sm:$0xff]   ;;  %s4268_s20 = smov 32   ;;  %vm1996_vm7 = vcmask 1048320   ;;  %vm2383_vm10 = vcmask 123904   ;;  %s5170_s11 = sld [smem:[#allocation59_spill]]  ;;  %vm2788_vm15 = vcmask 9216  }
 0x13d   : > { %s1015_s8 = scalar_lea.vmem %s5168_s3, %s3181_s22  ;;  %s5171_s3 = sld [smem:[#allocation62_spill]] }
 0x13e   : > { %v1027_v1 = vld [vmem:[%s1015_s8] sm:$0xff]  ;;  %v1028_v2 = vld [vmem:[%s1015_s8 + $0x8] sm:$0xff]  ;;  %3262 = vmatpush3.bf16.msra.mxu1 %v3650_v6  ;;  %s5172_s2 = sld [smem:[#allocation61_spill]]  ;;  %s3177_s16 = sshll.u32 %s4417_s29, 5 }
 0x13f   : > { %v1034_v3 = vpack.c.bf16 %v1028_v2, %v1027_v1  ;;  %3273 = vmatprep.subr.bf16.mxu1 %v4263_v0  ;;  %s5174_s12 = sld [smem:[#allocation64_spill]]  ;;  %s2791_s29 = scalar_lea.sflag [#allocation5], %s4678_s17 }
 0x140   : > { %p5175_p10 = scmp.ne.s32.totalorder %s5142_s25, 0 }
 0x141   : > { %3254 = vmatpush3.bf16.msra.mxu0 %v1034_v3  ;;  %s1020_s14 = scalar_lea.vmem %s5169_s15, %s3181_s22  ;;  %s3088_s15 = sshll.u32 %s4678_s17, 1 }
 0x142   : > { %3267 = vmatprep.subr.bf16.mxu0 %v4263_v0  ;;  %v1032_v5 = vld [vmem:[%s1020_s14] sm:$0xff]  ;;  %v1033_v6 = vld [vmem:[%s1020_s14 + $0x8] sm:$0xff] }
 0x144   : > { %3256 = vmatmul.mubr.msk.bf16.vlgmr.msra.gmra.mxu0 %vm1040_vm1, %v3648_v4 }
 0x145   : > { %3269 = vmatprep.mubr.msk.bf16.mxu0 %vm4264_vm0, %v4263_v0  ;;  %s5016_s8 = scalar_lea.hbm %s5174_s12, %s3177_s16 }
 0x204   : > { %v1078_v7 = vpop.f32.mrf.mxu0 }
 0x205   : > { %v1085_v10 = vadd.f32 %v1078_v7, %v1027_v1 }
 0x206   : > { %v3257_v8 = vpop.f32.mrf.mxu0 }
 0x208   : > { %v1081_v9 = vpop.f32.mrf.mxu0 }
 0x209   : > { %v1086_v11 = vadd.f32 %v1081_v9, %v1028_v2 }
 0x20a   : > { %v3258_v12 = vpop.f32.mrf.mxu0 }
 0x20b   : > { %v1091_v13 = vpack.c.bf16 %v1086_v11, %v1085_v10 }
 0x20d   : > { %3264 = vmatmul.mubr.msk.bf16.vlgmr.msra.gmra.mxu1 %vm1111_vm2, %v1091_v13 }
 0x20e   : > { %3277 = vmatprep.mubr.msk.bf16.mxu1 %vm4264_vm0, %v4263_v0  ;;  %3274 = vmatpush3.bf16.msra.mxu1 %v3651_v26 }
 0x20f   : > { %3275 = vmatprep.subr.bf16.mxu1 %v4263_v0 }
 0x212   : > { %3276 = vmatpush3.bf16.msra.mxu1 %v3652_v27 }
 0x213   : > { %3289 = vmatprep.subr.bf16.mxu1 %v4263_v0 }
 0x2cd   : > { %v1149_v15 = vpop.f32.mrf.mxu1 }
 0x2ce   : > { %v1150_v16 = vadd.f32 %v3096_v14, %v1149_v15 }
 0x2cf   : > { %v3265_v17 = vpop.f32.mrf.mxu1 }
 0x2d0   : > { %v1156_v19 = vmax.f32 %v1150_v16, 0.0  ;;  %v4819_v16 = vld [vmem:[%s876_s0] ss:$0 sm:$0xff]  ;;  %s1010_s0 = scalar_lea.vmem [#allocation29], %s3088_s15 }
 0x2d1   : > { %v1152_v18 = vpop.f32.mrf.mxu1  ;;  %s2804_s6 = sshll.u32 %s1010_s0, 4  ;;  %s5018_s6 = int_to_ptr.vmem [resolvable:$true] %s2804_s6 }
 0x2d2   : > { %v1153_v20 = vadd.f32 %v3096_v14, %v1152_v18  ;;  %v1158_v23 = vadd.f32 %v1156_v19, %v1027_v1  ;;  %v4269_v19 = vmov -1e+09   ;;  %s4141_s7 = scalar_lea.vmem %s5018_s6, 32 }
 0x2d3   : > { %v3266_v21 = vpop.f32.mrf.mxu1  ;;  %p4142_p5 = scmp.ne.s32.totalorder %s5018_s6, %s4141_s7 }
 0x2d4   : > { %v1157_v22 = vmax.f32 %v1153_v20, 0.0 }
 0x2d5   : > { %p4143_p9 = pnand %p4142_p5, %p5175_p10 }
 0x2d6   : > { %v1159_v24 = vadd.f32 %v1157_v22, %v1028_v2 }
 0x2d7   : > { %p4144_p11 = pneg %p4143_p9 }
 0x2d8   : > { %v1160_v25 = vpack.c.bf16 %v1159_v24, %v1158_v23 }
 0x2da   : > { %3268 = vmatpush3.bf16.msra.mxu0 %v1160_v25 }
 0x2db   : > { %3281 = vmatprep.subr.bf16.mxu0 %v4263_v0 }
 0x2dd   : > { %3270 = vmatmul.mubr.msk.bf16.vlgmr.msra.gmra.mxu0 %vm1040_vm1, %v3648_v4 }
 0x2de   : > { %3285 = vmatprep.mubr.msk.bf16.mxu0 %vm4264_vm0, %v4263_v0  ;;  %3282 = vmatpush3.bf16.msra.mxu0 %v3653_v35 }
 0x2df   : > { %3283 = vmatprep.subr.bf16.mxu0 %v4263_v0 }
 0x2e2   : > { %3284 = vmatpush3.bf16.msra.mxu0 %v3655_v37 }
 0x2e3   : > { %3297 = vmatprep.subr.bf16.mxu0 %v4263_v0 }
 0x39d   : > { %v1195_v28 = vpop.f32.mrf.mxu0 }
 0x39e   : > { %v1202_v31 = vadd.f32 %v1195_v28, %v1158_v23 }
 0x39f   : > { %v3271_v29 = vpop.f32.mrf.mxu0 }
 0x3a1   : > { %v1198_v30 = vpop.f32.mrf.mxu0 }
 0x3a2   : > { %v1203_v32 = vadd.f32 %v1198_v30, %v1159_v24 }
 0x3a3   : > { %v3272_v33 = vpop.f32.mrf.mxu0 }
 0x3a4   : > { %v1209_v34 = vpack.c.bf16 %v1203_v32, %v1202_v31 }
 0x3a6   : > { %3278 = vmatmul.mubr.msk.bf16.vlgmr.msra.gmra.mxu1 %vm1111_vm2, %v1209_v34 }
 0x3a7   : > { %3293 = vmatprep.mubr.msk.bf16.mxu1 %vm4264_vm0, %v4263_v0  ;;  %3290 = vmatpush3.bf16.msra.mxu1 %v3654_v36 }
 0x3a8   : > { %3291 = vmatprep.subr.bf16.mxu1 %v4263_v0 }
 0x3ab   : > { %3292 = vmatpush3.bf16.msra.mxu1 %v3656_v38 }
 0x3ac   : > { %3305 = vmatprep.subr.bf16.mxu1 %v4263_v0 }
 0x466   : > { %v1267_v40 = vpop.f32.mrf.mxu1 }
 0x467   : > { %v1268_v42 = vadd.f32 %v3101_v39, %v1267_v40 }
 0x468   : > { %v3279_v41 = vpop.f32.mrf.mxu1 }
 0x469   : > { %v4765_v46 = vadd.f32 %v1268_v42, %v1158_v23 }
 0x46a   : > { %v1270_v43 = vpop.f32.mrf.mxu1 }
 0x46b   : > { %v1271_v44 = vadd.f32 %v3101_v39, %v1270_v43 }
 0x46c   : > { %v3280_v45 = vpop.f32.mrf.mxu1 }
 0x46d   : > { %v4767_v47 = vadd.f32 %v1271_v44, %v1159_v24 }
 0x46f   : > { %v1280_v49 = vpack.c.bf16 %v4767_v47, %v4765_v46 }
 0x471   : > { %3286 = vmatmul.mubr.msk.bf16.vlgmr.msra.gmra.mxu0 %vm1111_vm2, %v1280_v49  ;;  %3294 = vmatmul.mubr.msk.bf16.vlgmr.msra.gmra.mxu1 %vm1111_vm2, %v1280_v49 }
 0x472   : > { %3298 = vmatpush3.bf16.msra.mxu0 %v3657_v48  ;;  %3301 = vmatprep.mubr.msk.bf16.mxu0 %vm4264_vm0, %v4263_v0 }
 0x473   : > { %3299 = vmatprep.subr.bf16.mxu0 %v4263_v0  ;;  %3307 = vmatprep.mubr.msk.bf16.mxu1 %vm4264_vm0, %v4263_v0 }
 0x476   : > { %3300 = vmatpush3.bf16.msra.mxu0 %v3658_v50 }
 0x477   : > { %3311 = vmatprep.subr.bf16.mxu0 %v4263_v0 }
 0x479   : > { %3302 = vmatmul.mubr.msk.bf16.vlgmr.msra.gmra.mxu0 %vm1111_vm2, %v1280_v49 }
 0x47a   : > { %3313 = vmatprep.mubr.msk.bf16.mxu0 %vm4264_vm0, %v4263_v0 }
 0x531   : > { %v1330_v52 = vpop.f32.mrf.mxu0  ;;  %v1387_v53 = vpop.f32.mrf.mxu1 }
 0x533   : > { %v3287_v54 = vpop.f32.mrf.mxu0  ;;  %v3295_v55 = vpop.f32.mrf.mxu1 }
 0x535   : > { %v1333_v56 = vpop.f32.mrf.mxu0  ;;  %v1390_v57 = vpop.f32.mrf.mxu1 }
 0x536   : > { %v1466_v58 = vpack.c.bf16 %v1390_v57, %v1387_v53  ;;  %v1465_v63 = vpack.c.bf16 %v1333_v56, %v1330_v52 }
 0x537   : > { %v3288_v59 = vpop.f32.mrf.mxu0  ;;  %v3296_v60 = vpop.f32.mrf.mxu1 }
 0x538   : > { %1729 = vrot.lane.b32.xlu1 %v1466_v58, %s4266_s10  ;;  %1592 = vrot.lane.b32.xlu0 %v1466_v58, %s4267_s13  ;;  %v1471_v61 = vsel %vm1111_vm2, %v1466_v58, 0 }
 0x539   : > { %v1444_v62 = vpop.f32.mrf.mxu0  ;;  %3306 = vmatpush3.bf16.xpose.msra.mxu1 %v1471_v61 }
 0x53a   : > { %3317 = vmatprep.subr.bf16.mxu1 %v4263_v0 }
 0x53b   : > { %v3303_v1 = vpop.f32.mrf.mxu0 }
 0x53c   : > { %1727 = vrot.lane.b32.xlu1 %v1465_v63, %s4266_s10  ;;  %1589 = vrot.lane.b32.xlu0 %v1465_v63, %s4267_s13 }
 0x53d   : > { %v1447_v2 = vpop.f32.mrf.mxu0 }
 0x53e   : > { %v4788_v3 = vpack.c.bf16 %v1447_v2, %v1444_v62 }
 0x53f   : > { %v3304_v4 = vpop.f32.mrf.mxu0 }
 0x540   : > { %1863 = vrot.lane.b32.xlu1 %v1465_v63, %s4268_s20  ;;  %1865 = vrot.lane.b32.xlu0 %v1466_v58, %s4268_s20 }
 0x541   : > { %3308 = vmatmul.mubr.msk.bf16.vlgmr.msra.gmra.mxu1 %vm1111_vm2, %v1465_v63  ;;  %3312 = vmatpush3.bf16.msra.mxu0 %v4788_v3 }
 0x542   : > { %3319 = vmatprep.mubr.msk.bf16.mxu1 %vm4264_vm0, %v4263_v0  ;;  %3323 = vmatprep.subr.bf16.mxu0 %v4263_v0 }
 0x544   : > { %1452 = vperm.xlu0 %3646, %v1032_v5   ;;  %1455 = vperm.xlu1 %3647, %v1033_v6  }
 0x5aa   : > { %v1593_v7 = vpop.permute.xlu0 %1592  ;;  %v1730_v9 = vpop.permute.xlu1 %1729 }
 0x5ab   : > { %v1598_v8 = vsel %vm1111_vm2, %v1593_v7, 0  ;;  %v1735_v11 = vsel %vm1111_vm2, %v1730_v9, 0 }
 0x5ac   : > { %3318 = vmatpush3.bf16.xpose.msra.mxu1 %v1598_v8 }
 0x5ad   : > { %3329 = vmatprep.subr.bf16.mxu1 %v4263_v0 }
 0x5ae   : > { %v1590_v10 = vpop.permute.xlu0 %1589  ;;  %v1728_v13 = vpop.permute.xlu1 %1727 }
 0x5b2   : > { %v1866_v12 = vpop.permute.xlu0 %1865  ;;  %v1864_v15 = vpop.permute.xlu1 %1863 }
 0x5b3   : > { %3320 = vmatmul.mubr.msk.bf16.vlgmr.msra.gmra.mxu1 %vm1111_vm2, %v1590_v10  ;;  %v1871_v14 = vsel %vm1111_vm2, %v1866_v12, 0 }
 0x5b4   : > { %3330 = vmatpush3.bf16.xpose.msra.mxu1 %v1735_v11  ;;  %3331 = vmatprep.mubr.msk.bf16.mxu1 %vm4264_vm0, %v4263_v0 }
 0x5b5   : > { %3341 = vmatprep.subr.bf16.mxu1 %v4263_v0 }
 0x5bb   : > { %3332 = vmatmul.mubr.msk.bf16.vlgmr.msra.gmra.mxu1 %vm1111_vm2, %v1728_v13 }
 0x5bc   : > { %3342 = vmatpush3.bf16.xpose.msra.mxu1 %v1871_v14  ;;  %3343 = vmatprep.mubr.msk.bf16.mxu1 %vm4264_vm0, %v4263_v0 }
 0x5bd   : > { %3353 = vmatprep.subr.bf16.mxu1 %v4263_v0 }
 0x5bf   : > { %v1453_v17 = vpop.permute.xlu0 %1452  ;;  %v1456_v18 = vpop.permute.xlu1 %1455 }
 0x5c0   : > { %vm1461_vm3 = vcmp.eq.s32.totalorder %v1453_v17, %v4819_v16  ;;  %vm1462_vm4 = vcmp.eq.s32.totalorder %v1456_v18, %v4819_v16 }
 0x5c1   : > { %v1463_v20 = vsel %vm1461_vm3, 0.0, %v4269_v19  ;;  %v1464_v25 = vsel %vm1462_vm4, 0.0, %v4269_v19 }
 0x5c3   : > { %3344 = vmatmul.mubr.msk.bf16.vlgmr.msra.gmra.mxu1 %vm1111_vm2, %v1864_v15 }
 0x5c4   : > { %3369 = vmatprep.mubr.msk.bf16.mxu1 %vm4264_vm0, %v4263_v0 }
 0x601   : > { %v1507_v21 = vpop.f32.mrf.mxu1 }
 0x602   : > { %v1514_v22 = vmul.f32 0.35355338, %v1507_v21 }
 0x603   : > { %v3309_v23 = vpop.f32.mrf.mxu1 }
 0x604   : > { %v1516_v24 = vadd.f32 %v1514_v22, %v1463_v20 }
 0x605   : > { %v1510_v26 = vpop.f32.mrf.mxu1 }
 0x606   : > { %v1515_v27 = vmul.f32 0.35355338, %v1510_v26  ;;  %v1518_v28 = vsel %vm1040_vm1, %v1516_v24, -inf }
 0x607   : > { %1519 = vmax.xlane.f32.xlu1 %v1518_v28  ;;  %v3310_v29 = vpop.f32.mrf.mxu1 }
 0x608   : > { %v1517_v30 = vadd.f32 %v1515_v27, %v1464_v25 }
 0x60a   : > { %v1521_v31 = vsel %vm1040_vm1, %v1517_v30, -inf }
 0x60b   : > { %1522 = vmax.xlane.f32.xlu0 %v1521_v31 }
 0x673   : > { %v1634_v32 = vpop.f32.mrf.mxu1 }
 0x674   : > { %v1641_v33 = vmul.f32 0.35355338, %v1634_v32 }
 0x675   : > { %v3321_v34 = vpop.f32.mrf.mxu1 }
 0x676   : > { %v1643_v35 = vadd.f32 %v1641_v33, %v1463_v20 }
 0x677   : > { %v1637_v36 = vpop.f32.mrf.mxu1 }
 0x678   : > { %v1642_v37 = vmul.f32 0.35355338, %v1637_v36  ;;  %v1645_v38 = vsel %vm1040_vm1, %v1643_v35, -inf }
 0x679   : > { %1646 = vmax.xlane.f32.xlu0 %v1645_v38  ;;  %v3322_v39 = vpop.f32.mrf.mxu1 }
 0x67a   : > { %v1644_v40 = vadd.f32 %v1642_v37, %v1464_v25 }
 0x67b   : > { %v1771_v41 = vpop.f32.mrf.mxu1 }
 0x67c   : > { %v1778_v42 = vmul.f32 0.35355338, %v1771_v41  ;;  %v1648_v43 = vsel %vm1040_vm1, %v1644_v40, -inf }
 0x67d   : > { %1649 = vmax.xlane.f32.xlu1 %v1648_v43  ;;  %v3333_v44 = vpop.f32.mrf.mxu1 }
 0x67e   : > { %v1780_v45 = vadd.f32 %v1778_v42, %v1463_v20 }
 0x67f   : > { %v1774_v48 = vpop.f32.mrf.mxu1 }
 0x680   : > { %v1779_v49 = vmul.f32 0.35355338, %v1774_v48  ;;  %v1782_v50 = vsel %vm1040_vm1, %v1780_v45, -inf }
 0x681   : > { %1783 = vmax.xlane.f32.xlu0 %v1782_v50  ;;  %v3334_v51 = vpop.f32.mrf.mxu1 }
 0x682   : > { %v1781_v52 = vadd.f32 %v1779_v49, %v1464_v25 }
 0x683   : > { %v1907_v53 = vpop.f32.mrf.mxu1 }
 0x684   : > { %v1914_v54 = vmul.f32 0.35355338, %v1907_v53  ;;  %v1785_v55 = vsel %vm1040_vm1, %v1781_v52, -inf }
 0x685   : > { %1786 = vmax.xlane.f32.xlu1 %v1785_v55  ;;  %v3345_v56 = vpop.f32.mrf.mxu1 }
 0x686   : > { %v1916_v57 = vadd.f32 %v1914_v54, %v1463_v20 }
 0x687   : > { %v1910_v58 = vpop.f32.mrf.mxu1 }
 0x688   : > { %v1915_v59 = vmul.f32 0.35355338, %v1910_v58  ;;  %v1918_v60 = vsel %vm1040_vm1, %v1916_v57, -inf }
 0x689   : > { %1919 = vmax.xlane.f32.xlu0 %v1918_v60  ;;  %v3346_v61 = vpop.f32.mrf.mxu1 }
 0x68a   : > { %v4830_v62 = vadd.f32 %v1915_v59, %v1464_v25 }
 0x68c   : > { %v1921_v63 = vsel %vm1040_vm1, %v4830_v62, -inf }
 0x68d   : > { %1922 = vmax.xlane.f32.xlu1 %v1921_v63 }
 0x690   : > { %v1520_v1 = vpop.xlane.xlu1 %1519 }
 0x691   : > { %v1524_v2 = vsub.f32 %v1516_v24, %v1520_v1 }
 0x693   : > { %v1526_v4 = vmul.f32 1.442695, %v1524_v2 }
 0x694   : > { %v1523_v5 = vpop.xlane.xlu0 %1522 }
 0x695   : > { %3679 = vpow2.f32 %v1526_v4  ;;  %v1525_v6 = vsub.f32 %v1517_v30, %v1523_v5 }
 0x697   : > { %v1528_v7 = vmul.f32 1.442695, %v1525_v6 }
 0x699   : > { %3681 = vpow2.f32 %v1528_v7 }
 0x6a2   : > { %v3680_v8 = vpop.eup %3679 }
 0x6a3   : > { %v1530_v9 = vsel %vm1040_vm1, %v3680_v8, 0.0 }
 0x6a4   : > { %1531 = vadd.xlane.f32.xlu0 %v1530_v9 }
 0x6a6   : > { %v3682_v10 = vpop.eup %3681 }
 0x6a7   : > { %v1533_v11 = vsel %vm1040_vm1, %v3682_v10, 0.0 }
 0x6a8   : > { %1534 = vadd.xlane.f32.xlu1 %v1533_v11 }
 0x702   : > { %v1647_v12 = vpop.xlane.xlu0 %1646 }
 0x703   : > { %v1651_v13 = vsub.f32 %v1643_v35, %v1647_v12 }
 0x705   : > { %v1653_v14 = vmul.f32 1.442695, %v1651_v13 }
 0x706   : > { %v1650_v15 = vpop.xlane.xlu1 %1649 }
 0x707   : > { %3683 = vpow2.f32 %v1653_v14  ;;  %v1652_v17 = vsub.f32 %v1644_v40, %v1650_v15 }
 0x709   : > { %v1655_v18 = vmul.f32 1.442695, %v1652_v17 }
 0x70a   : > { %v1784_v19 = vpop.xlane.xlu0 %1783 }
 0x70b   : > { %3685 = vpow2.f32 %v1655_v18  ;;  %v1788_v20 = vsub.f32 %v1780_v45, %v1784_v19  ;;  %v3659_v19 = vld [vmem:[%s5068_s9 + $0x38] sm:$0xff]  }
 0x70c   : > { %3354 = vmatpush3.bf16.msra.mxu1 %v3659_v19 }
 0x70d   : > { %v1790_v21 = vmul.f32 1.442695, %v1788_v20  ;;  %3355 = vmatprep.subr.bf16.mxu1 %v4263_v0 }
 0x70e   : > { %v1787_v22 = vpop.xlane.xlu1 %1786 }
 0x70f   : > { %3687 = vpow2.f32 %v1790_v21  ;;  %v1789_v23 = vsub.f32 %v1781_v52, %v1787_v22  ;;  %v3660_v21 = vld [vmem:[%s5068_s9 + $0x30] sm:$0xff]  }
 0x710   : > { %3356 = vmatpush3.bf16.msra.mxu1 %v3660_v21 }
 0x711   : > { %v1792_v24 = vmul.f32 1.442695, %v1789_v23  ;;  %3357 = vmatprep.subr.bf16.mxu1 %v4263_v0 }
 0x712   : > { %v1920_v25 = vpop.xlane.xlu0 %1919 }
 0x713   : > { %3689 = vpow2.f32 %v1792_v24  ;;  %v1924_v26 = vsub.f32 %v1916_v57, %v1920_v25  ;;  %v3661_v24 = vld [vmem:[%s5068_s9 + $0x28] sm:$0xff]  }
 0x714   : > { %v3684_v27 = vpop.eup %3683  ;;  %3358 = vmatpush3.bf16.msra.mxu1 %v3661_v24  ;;  %v3670_v24 = vld [vmem:[#allocation18] sm:$0xff]  }
 0x715   : > { %v1926_v28 = vmul.f32 1.442695, %v1924_v26  ;;  %v1657_v29 = vsel %vm1040_vm1, %v3684_v27, 0.0  ;;  %3359 = vmatprep.subr.bf16.mxu1 %v4263_v0 }
 0x716   : > { %1658 = vadd.xlane.f32.xlu0 %v1657_v29  ;;  %v1923_v38 = vpop.xlane.xlu1 %1922 }
 0x717   : > { %3691 = vpow2.f32 %v1926_v28  ;;  %v1925_v42 = vsub.f32 %v4830_v62, %v1923_v38 }
 0x718   : > { %v3686_v30 = vpop.eup %3685 }
 0x719   : > { %v1660_v31 = vsel %vm1040_vm1, %v3686_v30, 0.0  ;;  %v1928_v48 = vmul.f32 1.442695, %v1925_v42 }
 0x71a   : > { %1661 = vadd.xlane.f32.xlu1 %v1660_v31  ;;  %v3664_v31 = vld [vmem:[%s5068_s9 + $0x10] sm:$0xff]  }
 0x71c   : > { %v3688_v32 = vpop.eup %3687 }
 0x71d   : > { %v1794_v33 = vsel %vm1040_vm1, %v3688_v32, 0.0 }
 0x71e   : > { %1795 = vadd.xlane.f32.xlu0 %v1794_v33  ;;  %v3666_v33 = vld [vmem:[%s5068_s9] sm:$0xff]  }
 0x720   : > { %v3690_v34 = vpop.eup %3689 }
 0x721   : > { %v1797_v35 = vsel %vm1040_vm1, %v3690_v34, 0.0 }
 0x722   : > { %1798 = vadd.xlane.f32.xlu1 %v1797_v35 }
 0x724   : > { %v3692_v36 = vpop.eup %3691 }
 0x725   : > { %v1930_v37 = vsel %vm1040_vm1, %v3692_v36, 0.0 }
 0x726   : > { %1931 = vadd.xlane.f32.xlu0 %v1930_v37 }
 0x72d   : > { %v1532_v39 = vpop.xlane.xlu0 %1531 }
 0x72e   : > { %3693 = vrcp.f32 %v1532_v39 }
 0x731   : > { %v1535_v40 = vpop.xlane.xlu1 %1534 }
 0x732   : > { %3695 = vrcp.f32 %v1535_v40 }
 0x733   : > { %1805 = vrot.lane.b32.xlu1 %v4788_v3, %s4266_s10  ;;  %3697 = vpow2.f32 %v1928_v48 }
 0x73b   : > { %v3694_v41 = vpop.eup %3693 }
 0x73c   : > { %1669 = vrot.lane.b32.xlu0 %v4788_v3, %s4267_s13  ;;  %v1538_v44 = vmul.f32 %v3694_v41, %v3680_v8 }
 0x73f   : > { %v3696_v43 = vpop.eup %3695 }
 0x740   : > { %v1539_v45 = vmul.f32 %v3696_v43, %v3682_v10  ;;  %v3698_v50 = vpop.eup %3697 }
 0x741   : > { %v1933_v51 = vsel %vm1040_vm1, %v3698_v50, 0.0 }
 0x742   : > { %v1540_v49 = vpack.c.bf16 %v1539_v45, %v1538_v44 }
 0x744   : > { %3314 = vmatmul.mubr.msk.bf16.vlgmr.msra.gmra.mxu0 %vm1040_vm1, %v1540_v49 }
 0x745   : > { %3325 = vmatprep.mubr.msk.bf16.mxu0 %vm4264_vm0, %v4263_v0 }
 0x757   : > { %1934 = vadd.xlane.f32.xlu1 %v1933_v51 }
 0x768   : > { %1941 = vrot.lane.b32.xlu1 %v4788_v3, %s4268_s20 }
 0x79f   : > { %v1659_v52 = vpop.xlane.xlu0 %1658 }
 0x7a0   : > { %3699 = vrcp.f32 %v1659_v52 }
 0x7a3   : > { %v1662_v53 = vpop.xlane.xlu1 %1661 }
 0x7a4   : > { %3701 = vrcp.f32 %v1662_v53 }
 0x7a7   : > { %v1796_v54 = vpop.xlane.xlu0 %1795 }
 0x7a8   : > { %3703 = vrcp.f32 %v1796_v54 }
 0x7ab   : > { %v1799_v55 = vpop.xlane.xlu1 %1798 }
 0x7ac   : > { %3705 = vrcp.f32 %v1799_v55  ;;  %v1022_v55 = vlaneseq }
 0x7ad   : > { %v3700_v56 = vpop.eup %3699 }
 0x7ae   : > { %v1665_v59 = vmul.f32 %v3700_v56, %v3684_v27  ;;  %v3662_v27 = vld [vmem:[%s5068_s9 + $0x20] sm:$0xff]   ;;  %v1023_v56 = vand.u32 127, %v1022_v55 }
 0x7af   : > { %v1932_v57 = vpop.xlane.xlu0 %1931  ;;  %v1806_v3 = vpop.permute.xlu1 %1805  ;;  %3360 = vmatpush3.bf16.msra.mxu1 %v3662_v27 }
 0x7b0   : > { %3707 = vrcp.f32 %v1932_v57  ;;  %3361 = vmatprep.subr.bf16.mxu1 %v4263_v0  ;;  %vm1024_vm8 = vcmp.lt.s32.totalorder %v1023_v56, 32 }
 0x7b1   : > { %v3702_v58 = vpop.eup %3701 }
 0x7b2   : > { %v1666_v60 = vmul.f32 %v3702_v58, %v3686_v30  ;;  %v3663_v30 = vld [vmem:[%s5068_s9 + $0x18] sm:$0xff]  }
 0x7b3   : > { %v1670_v61 = vpop.permute.xlu0 %1669  ;;  %3362 = vmatpush3.bf16.msra.mxu1 %v3663_v30 }
 0x7b4   : > { %3324 = vmatpush3.bf16.msra.mxu0 %v1670_v61  ;;  %v1667_v62 = vpack.c.bf16 %v1666_v60, %v1665_v59  ;;  %3363 = vmatprep.subr.bf16.mxu1 %v4263_v0  ;;  %v4910_v59 = vsel %vm1024_vm8, 1.0, %v4263_v0 }
 0x7b5   : > { %3335 = vmatprep.subr.bf16.mxu0 %v4263_v0  ;;  %v3704_v63 = vpop.eup %3703 }
 0x7b6   : > { %v1802_v2 = vmul.f32 %v3704_v63, %v3688_v32  ;;  %v3665_v32 = vld [vmem:[%s5068_s9 + $0x8] sm:$0xff]  }
 0x7b7   : > { %3326 = vmatmul.mubr.msk.bf16.vlgmr.msra.gmra.mxu0 %vm1040_vm1, %v1667_v62  ;;  %3364 = vmatpush3.bf16.msra.mxu1 %v3664_v31 }
 0x7b8   : > { %3336 = vmatpush3.bf16.msra.mxu0 %v1806_v3  ;;  %3337 = vmatprep.mubr.msk.bf16.mxu0 %vm4264_vm0, %v4263_v0 }
 0x7b9   : > { %v3706_v1 = vpop.eup %3705  ;;  %3347 = vmatprep.subr.bf16.mxu0 %v4263_v0  ;;  %3365 = vmatprep.subr.bf16.mxu1 %v4263_v0 }
 0x7ba   : > { %v1803_v4 = vmul.f32 %v3706_v1, %v3690_v34 }
 0x7bb   : > { %3366 = vmatpush3.bf16.msra.mxu1 %v3665_v32 }
 0x7bc   : > { %v1804_v5 = vpack.c.bf16 %v1803_v4, %v1802_v2  ;;  %3367 = vmatprep.subr.bf16.mxu1 %v4263_v0  ;;  %v3667_v2 = vld [vmem:[#allocation15 + $0x8] sm:$0xff]   ;;  %v3668_v4 = vld [vmem:[#allocation15] sm:$0xff]  }
 0x7bd   : > { %v3708_v8 = vpop.eup %3707 }
 0x7be   : > { %v1938_v10 = vmul.f32 %v3708_v8, %v3692_v36 }
 0x7bf   : > { %3338 = vmatmul.mubr.msk.bf16.vlgmr.msra.gmra.mxu0 %vm1040_vm1, %v1804_v5  ;;  %3368 = vmatpush3.bf16.msra.mxu1 %v3666_v33 }
 0x7c0   : > { %3349 = vmatprep.mubr.msk.bf16.mxu0 %vm4264_vm0, %v4263_v0  ;;  %3403 = vmatprep.subr.bf16.mxu1 %v4263_v0 }
 0x7e0   : > { %v1935_v6 = vpop.xlane.xlu1 %1934 }
 0x7e1   : > { %3709 = vrcp.f32 %v1935_v6 }
 0x7e4   : > { %v1942_v7 = vpop.permute.xlu1 %1941 }
 0x7e5   : > { %3348 = vmatpush3.bf16.msra.mxu0 %v1942_v7 }
 0x7e6   : > { %3373 = vmatprep.subr.bf16.mxu0 %v4263_v0 }
 0x7ee   : > { %v3710_v9 = vpop.eup %3709 }
 0x7ef   : > { %v1939_v11 = vmul.f32 %v3710_v9, %v3698_v50 }
 0x7f1   : > { %v1940_v12 = vpack.c.bf16 %v1939_v11, %v1938_v10 }
 0x7f3   : > { %3350 = vmatmul.mubr.msk.bf16.vlgmr.msra.gmra.mxu0 %vm1040_vm1, %v1940_v12 }
 0x7f4   : > { %3377 = vmatprep.mubr.msk.bf16.mxu0 %vm4264_vm0, %v4263_v0  ;;  %3374 = vmatpush3.bf16.msra.mxu0 %v3667_v2  ;;  %v3141_v2 = vld [vmem:[#allocation24] ss:$0 sm:$0xff] }
 0x7f5   : > { %3375 = vmatprep.subr.bf16.mxu0 %v4263_v0 }
 0x7f8   : > { %3376 = vmatpush3.bf16.msra.mxu0 %v3668_v4 }
 0x7f9   : > { %3381 = vmatprep.subr.bf16.mxu0 %v4263_v0 }
 0x804   : > { %v1579_v13 = vpop.f32.mrf.mxu0 }
 0x805   : > { %1586 = vst.msk [vmem:[#allocation2] sm:$0xff] %vm1111_vm2, %v1579_v13  ;;  %v3131_v13 = vld [vmem:[#allocation21] ss:$0 sm:$0xff] }
 0x806   : > { %v3315_v14 = vpop.f32.mrf.mxu0 }
 0x808   : > { %v1582_v15 = vpop.f32.mrf.mxu0 }
 0x809   : > { %1587 = vst.msk [vmem:[#allocation2 + $0x8] sm:$0xff] %vm1111_vm2, %v1582_v15 }
 0x80a   : > { %v3316_v17 = vpop.f32.mrf.mxu0 }
 0x877   : > { %v1709_v18 = vpop.f32.mrf.mxu0 }
 0x878   : > { %1718 = vrot.lane.b32.xlu0 %v1709_v18, %s4268_s20  ;;  %v3132_v18 = vld [vmem:[#allocation23] ss:$0 sm:$0xff] }
 0x879   : > { %v3327_v20 = vpop.f32.mrf.mxu0 }
 0x87b   : > { %v1712_v22 = vpop.f32.mrf.mxu0 }
 0x87c   : > { %1720 = vrot.lane.b32.xlu1 %v1712_v22, %s4268_s20  ;;  %s5173_s20 = sld [smem:[#allocation63_spill]] }
 0x87d   : > { %v3328_v23 = vpop.f32.mrf.mxu0 }
 0x87e   : > { %v3669_v23 = vld [vmem:[#allocation18 + $0x8] sm:$0xff]  }
 0x87f   : > { %v1845_v25 = vpop.f32.mrf.mxu0 }
 0x880   : > { %1854 = vrot.lane.b32.xlu0 %v1845_v25, %s4266_s10  ;;  %v3133_v25 = vld [vmem:[#allocation17] ss:$0 sm:$0xff] }
 0x881   : > { %v3339_v26 = vpop.f32.mrf.mxu0 }
 0x883   : > { %v1848_v28 = vpop.f32.mrf.mxu0 }
 0x884   : > { %1856 = vrot.lane.b32.xlu1 %v1848_v28, %s4266_s10  ;;  %s4270_s10 = smov [#allocation29]  }
 0x885   : > { %v3340_v29 = vpop.f32.mrf.mxu0  ;;  %s4145_s24 = sshll.u32 %s4270_s10, 4  ;;  %s4146_s24 = int_to_ptr.vmem [resolvable:$false] %s4145_s24 }
 0x886   : > { %s4147_s15 = scalar_lea.vmem %s4146_s24, 64  ;;  %p4148_p7 = scmp.lt.s32.totalorder %s5018_s6, %s4146_s24 }
 0x887   : > { %p4149_p0 = scmp.lt.s32.totalorder %s4147_s15, %s4141_s7 }
 0x889   : > { %p4150_p8 = por %p4149_p0, %p4148_p7 }
 0x88b   : > { %p4151_p6 = pnand %p4150_p8, %p4144_p11 }
 0x8b3   : > { %v1981_v34 = vpop.f32.mrf.mxu0 }
 0x8b4   : > { %1990 = vrot.lane.b32.xlu0 %v1981_v34, %s4267_s13 }
 0x8b5   : > { %v3351_v35 = vpop.f32.mrf.mxu0 }
 0x8b6   : > { %v3137_v35 = vld [vmem:[#allocation20] ss:$0 sm:$0xff] }
 0x8b7   : > { %v1984_v36 = vpop.f32.mrf.mxu0 }
 0x8b8   : > { %1992 = vrot.lane.b32.xlu1 %v1984_v36, %s4267_s13 }
 0x8b9   : > { %v3352_v37 = vpop.f32.mrf.mxu0 }
 0x8ea   : > { %v1719_v38 = vpop.permute.xlu0 %1718 }
 0x8eb   : > { %1725 = vst.msk [vmem:[#allocation2] sm:$0xff] %vm1724_vm5, %v1719_v38 }
 0x8ee   : > { %v1721_v39 = vpop.permute.xlu1 %1720 }
 0x8ef   : > { %1726 = vst.msk [vmem:[#allocation2 + $0x8] sm:$0xff] %vm1724_vm5, %v1721_v39 }
 0x8f2   : > { %v1855_v40 = vpop.permute.xlu0 %1854 }
 0x8f3   : > { %1861 = vst.msk [vmem:[#allocation2] sm:$0xff] %vm1860_vm6, %v1855_v40 }
 0x8f6   : > { %v1857_v41 = vpop.permute.xlu1 %1856 }
 0x8f7   : > { %1862 = vst.msk [vmem:[#allocation2 + $0x8] sm:$0xff] %vm1860_vm6, %v1857_v41 }
 0x926   : > { %v1991_v42 = vpop.permute.xlu0 %1990 }
 0x927   : > { %1997 = vst.msk [vmem:[#allocation2] sm:$0xff] %vm1996_vm7, %v1991_v42 }
 0x92a   : > { %v1993_v43 = vpop.permute.xlu1 %1992 }
 0x92b   : > { %1998 = vst.msk [vmem:[#allocation2 + $0x8] sm:$0xff] %vm1996_vm7, %v1993_v43 }
 0x92e   : > { %v1999_v44 = vld [vmem:[#allocation2] sm:$0xff] }
 0x932   : > { %v2000_v45 = vld [vmem:[#allocation2 + $0x8] sm:$0xff] }
 0x933   : > { %v2017_v48 = vpack.c.bf16 %v2000_v45, %v1999_v44 }
 0x935   : > { %3370 = vmatmul.mubr.bf16.vlgmr.msra.gmra.mxu1 %v2017_v48 }
 0x936   : > { %3407 = vmatprep.mubr.msk.bf16.mxu1 %vm4264_vm0, %v4263_v0 }
 0x9f5   : > { %v2100_v49 = vpop.f32.mrf.mxu1 }
 0x9f6   : > { %v2107_v50 = vadd.f32 %v2100_v49, %v4765_v46 }
 0x9f7   : > { %v3371_v51 = vpop.f32.mrf.mxu1 }
 0x9f8   : > { %2111 = vadd.xlane.f32.xlu0 %v2107_v50 }
 0x9f9   : > { %v2103_v52 = vpop.f32.mrf.mxu1 }
 0x9fa   : > { %v2108_v53 = vadd.f32 %v2103_v52, %v4767_v47 }
 0x9fb   : > { %v3372_v54 = vpop.f32.mrf.mxu1 }
 0x9fc   : > { %2113 = vadd.xlane.f32.xlu1 %v2108_v53 }
 0xa81   : > { %v2112_v57 = vpop.xlane.xlu0 %2111 }
 0xa82   : > { %v2115_v58 = vmul.f32 0.03125, %v2112_v57  ;;  %v2334_v57 = vshrl.u32 %v1022_v55, 7 }
 0xa84   : > { %v2117_v60 = vsub.f32 %v2107_v50, %v2115_v58  ;;  %vm2335_vm9 = vcmp.eq.s32.totalorder %v2334_v57, %v4819_v16  ;;  %v3142_v16 = vld [vmem:[#allocation26] ss:$0 sm:$0xff] }
 0xa85   : > { %v2114_v61 = vpop.xlane.xlu1 %2113  ;;  %v3143_v58 = vsel %vm2335_vm9, 1.0, %v4263_v0 }
 0xa86   : > { %v2116_v62 = vmul.f32 0.03125, %v2114_v61  ;;  %v2119_v46 = vmul.f32 %v4910_v59, %v2117_v60  ;;  %v2384_v60 = vsel %vm2383_vm10, %v3143_v58, 0.0 }
 0xa88   : > { %v2118_v63 = vsub.f32 %v2108_v53, %v2116_v62  ;;  %v2121_v3 = vmul.f32 %v2119_v46, %v2119_v46 }
 0xa8a   : > { %2123 = vadd.xlane.f32.xlu0 %v2121_v3  ;;  %v2120_v47 = vmul.f32 %v4910_v59, %v2118_v63 }
 0xa8c   : > { %v2122_v1 = vmul.f32 %v2120_v47, %v2120_v47 }
 0xa8e   : > { %2125 = vadd.xlane.f32.xlu0 %v2122_v1 }
 0xb13   : > { %v2124_v5 = vpop.xlane.xlu0 %2123 }
 0xb14   : > { %v2127_v6 = vmul.f32 0.03125, %v2124_v5 }
 0xb16   : > { %v2129_v7 = vadd.f32 1e-05, %v2127_v6 }
 0xb17   : > { %v2126_v8 = vpop.xlane.xlu0 %2125 }
 0xb18   : > { %3711 = vrsqrt.f32 %v2129_v7  ;;  %v2128_v9 = vmul.f32 0.03125, %v2126_v8 }
 0xb1a   : > { %v2130_v10 = vadd.f32 1e-05, %v2128_v9 }
 0xb1c   : > { %3713 = vrsqrt.f32 %v2130_v10  ;;  %v2338_v10 = vpack.c.bf16 %v3143_v58, %v3143_v58  ;;  %v3678_v58 = vld [vmem:[#allocation27 + $0x10] sm:$0xff]  }
 0xb25   : > { %v3712_v11 = vpop.eup %3711 }
 0xb26   : > { %v2133_v12 = vmul.f32 %v3712_v11, %v2119_v46  ;;  %v3671_v11 = vld [vmem:[%s5077_s18 + $0x8] sm:$0xff]  }
 0xb28   : > { %v2141_v17 = vmul.f32 %v3131_v13, %v2133_v12  ;;  %v3672_v12 = vld [vmem:[%s5077_s18] sm:$0xff]  }
 0xb29   : > { %v3714_v14 = vpop.eup %3713 }
 0xb2a   : > { %v2134_v15 = vmul.f32 %v3714_v14, %v2120_v47  ;;  %v2149_v20 = vadd.f32 %v3132_v18, %v2141_v17 }
 0xb2c   : > { %v2142_v19 = vmul.f32 %v3131_v13, %v2134_v15 }
 0xb2e   : > { %v2150_v21 = vadd.f32 %v3132_v18, %v2142_v19 }
 0xb30   : > { %v2155_v22 = vpack.c.bf16 %v2150_v21, %v2149_v20 }
 0xb32   : > { %3378 = vmatmul.mubr.msk.bf16.vlgmr.msra.gmra.mxu0 %vm1111_vm2, %v2155_v22 }
 0xb33   : > { %3385 = vmatprep.mubr.msk.bf16.mxu0 %vm4264_vm0, %v4263_v0  ;;  %3382 = vmatpush3.bf16.msra.mxu0 %v3669_v23  ;;  %v3673_v23 = vld [vmem:[#allocation27 + $0x8] sm:$0xff]  }
 0xb34   : > { %3383 = vmatprep.subr.bf16.mxu0 %v4263_v0  ;;  %3404 = vmatpush3.bf16.msra.mxu1 %v3673_v23 }
 0xb35   : > { %3405 = vmatprep.subr.bf16.mxu1 %v4263_v0 }
 0xb37   : > { %3384 = vmatpush3.bf16.msra.mxu0 %v3670_v24  ;;  %v3674_v24 = vld [vmem:[#allocation27] sm:$0xff]  }
 0xb38   : > { %3389 = vmatprep.subr.bf16.mxu0 %v4263_v0  ;;  %3406 = vmatpush3.bf16.msra.mxu1 %v3674_v24 }
 0xb39   : > { %3419 = vmatprep.subr.bf16.mxu1 %v4263_v0 }
 0xbf2   : > { %v2212_v26 = vpop.f32.mrf.mxu0 }
 0xbf3   : > { %v2213_v28 = vadd.f32 %v3133_v25, %v2212_v26 }
 0xbf4   : > { %v3379_v27 = vpop.f32.mrf.mxu0 }
 0xbf5   : > { %v2219_v32 = vmax.f32 %v2213_v28, 0.0 }
 0xbf6   : > { %v2215_v29 = vpop.f32.mrf.mxu0 }
 0xbf7   : > { %v2216_v30 = vadd.f32 %v3133_v25, %v2215_v29  ;;  %v3145_v25 = vld [vmem:[%s5170_s11] ss:$0 sm:$0xff] }
 0xbf8   : > { %v3380_v31 = vpop.f32.mrf.mxu0 }
 0xbf9   : > { %v2220_v33 = vmax.f32 %v2216_v30, 0.0 }
 0xbfb   : > { %v2225_v34 = vpack.c.bf16 %v2220_v33, %v2219_v32  ;;  %v3675_v32 = vld [vmem:[%s5077_s18 + $0x18] sm:$0xff]  }
 0xbfd   : > { %3386 = vmatmul.mubr.msk.bf16.vlgmr.msra.gmra.mxu0 %vm1111_vm2, %v2225_v34 }
 0xbfe   : > { %3391 = vmatprep.mubr.msk.bf16.mxu0 %vm4264_vm0, %v4263_v0 }
 0xcbd   : > { %v2282_v36 = vpop.f32.mrf.mxu0 }
 0xcbe   : > { %v2283_v37 = vadd.f32 %v3137_v35, %v2282_v36  ;;  %v2532_v36 = vld [vmem:[%s5171_s3 + $0x10] sm:$0xff] }
 0xcbf   : > { %v3387_v38 = vpop.f32.mrf.mxu0 }
 0xcc0   : > { %v2289_v39 = vadd.f32 %v2283_v37, %v2149_v20  ;;  %v2533_v37 = vld [vmem:[%s5171_s3 + $0x18] sm:$0xff] }
 0xcc1   : > { %v2285_v40 = vpop.f32.mrf.mxu0  ;;  %v2536_v38 = vpack.c.bf16 %v2533_v37, %v2532_v36 }
 0xcc2   : > { %v2286_v41 = vadd.f32 %v3137_v35, %v2285_v40  ;;  %2293 = vadd.xlane.f32.xlu1 %v2289_v39  ;;  %v3676_v35 = vld [vmem:[%s5077_s18 + $0x10] sm:$0xff]   ;;  %v2531_v40 = vld [vmem:[%s5171_s3 + $0x8] sm:$0xff] }
 0xcc3   : > { %v3388_v42 = vpop.f32.mrf.mxu0 }
 0xcc4   : > { %v2290_v43 = vadd.f32 %v2286_v41, %v2150_v21  ;;  %v3149_v42 = vld [vmem:[%s5172_s2] ss:$0 sm:$0xff] }
 0xcc6   : > { %2295 = vadd.xlane.f32.xlu0 %v2290_v43 }
 0xd4b   : > { %v2294_v44 = vpop.xlane.xlu1 %2293 }
 0xd4c   : > { %v2297_v45 = vmul.f32 0.03125, %v2294_v44 }
 0xd4e   : > { %v2299_v48 = vsub.f32 %v2289_v39, %v2297_v45  ;;  %v2530_v39 = vld [vmem:[%s5171_s3] sm:$0xff] }
 0xd4f   : > { %v2296_v49 = vpop.xlane.xlu0 %2295  ;;  %v2535_v41 = vpack.c.bf16 %v2531_v40, %v2530_v39 }
 0xd50   : > { %v2298_v50 = vmul.f32 0.03125, %v2296_v49  ;;  %v2301_v51 = vmul.f32 %v4910_v59, %v2299_v48 }
 0xd52   : > { %v2300_v52 = vsub.f32 %v2290_v43, %v2298_v50  ;;  %v2303_v53 = vmul.f32 %v2301_v51, %v2301_v51 }
 0xd54   : > { %2305 = vadd.xlane.f32.xlu1 %v2303_v53  ;;  %v2302_v54 = vmul.f32 %v4910_v59, %v2300_v52 }
 0xd56   : > { %v2304_v56 = vmul.f32 %v2302_v54, %v2302_v54 }
 0xd58   : > { %2307 = vadd.xlane.f32.xlu0 %v2304_v56  ;;  %2385 = vadd.xlane.f32.xlu1 %v2384_v60 }
 0xddd   : > { %v2306_v61 = vpop.xlane.xlu1 %2305 }
 0xdde   : > { %v2309_v62 = vmul.f32 0.03125, %v2306_v61 }
 0xde0   : > { %v2311_v46 = vadd.f32 1e-05, %v2309_v62 }
 0xde1   : > { %v2308_v63 = vpop.xlane.xlu0 %2307  ;;  %v2386_v13 = vpop.xlane.xlu1 %2385 }
 0xde2   : > { %3715 = vrsqrt.f32 %v2311_v46  ;;  %v2310_v3 = vmul.f32 0.03125, %v2308_v63  ;;  %v2387_v14 = vmax.f32 %v2386_v13, 1.0 }
 0xde4   : > { %v2312_v47 = vadd.f32 1e-05, %v2310_v3 }
 0xde6   : > { %3717 = vrsqrt.f32 %v2312_v47  ;;  %v3171_v47 = vld [vmem:[%s5171_s3 + $0x30] sm:$0xff] }
 0xde7   : > { %3719 = vrcp.f32 %v2387_v14 }
 0xdef   : > { %v3716_v59 = vpop.eup %3715 }
 0xdf0   : > { %v2315_v1 = vmul.f32 %v3716_v59, %v2301_v51  ;;  %v3677_v51 = vld [vmem:[#allocation27 + $0x18] sm:$0xff]  }
 0xdf1   : > { %v3172_v59 = vld [vmem:[%s5171_s3 + $0x38] sm:$0xff] }
 0xdf2   : > { %v2323_v5 = vmul.f32 %v3141_v2, %v2315_v1  ;;  %v2734_v1 = vpack.c.bf16 %v3172_v59, %v3171_v47 }
 0xdf3   : > { %v3718_v4 = vpop.eup %3717 }
 0xdf4   : > { %v2316_v55 = vmul.f32 %v3718_v4, %v2302_v54  ;;  %v2331_v7 = vadd.f32 %v3142_v16, %v2323_v5  ;;  %v3720_v15 = vpop.eup %3719  ;;  %v3160_v54 = vld [vmem:[%s5170_s11 + $0x1] ss:$0 sm:$0xff]  ;;  %v3170_v4 = vld [vmem:[%s5171_s3 + $0x28] sm:$0xff] }
 0xdf6   : > { %v2324_v6 = vmul.f32 %v3141_v2, %v2316_v55  ;;  %v3169_v2 = vld [vmem:[%s5171_s3 + $0x20] sm:$0xff] }
 0xdf7   : > { %v2733_v55 = vpack.c.bf16 %v3170_v4, %v3169_v2 }
 0xdf8   : > { %v2332_v8 = vadd.f32 %v3142_v16, %v2324_v6 }
 0xdfa   : > { %v2339_v9 = vpack.c.bf16 %v2332_v8, %v2331_v7  ;;  %v3165_v8 = vld [vmem:[%s5172_s2 + $0x1] ss:$0 sm:$0xff] }
 0xdfc   : > { %3390 = vmatpush3.bf16.msra.mxu0 %v2339_v9 }
 0xdfd   : > { %3395 = vmatprep.subr.bf16.mxu0 %v4263_v0 }
 0xdff   : > { %3392 = vmatmul.mubr.msk.bf16.vlgmr.msra.gmra.mxu0 %vm1040_vm1, %v2338_v10 }
 0xe00   : > { %3396 = vmatpush3.bf16.msra.mxu0 %v3671_v11  ;;  %3399 = vmatprep.mubr.msk.bf16.mxu0 %vm4264_vm0, %v4263_v0 }
 0xe01   : > { %3397 = vmatprep.subr.bf16.mxu0 %v4263_v0 }
 0xe04   : > { %3398 = vmatpush3.bf16.msra.mxu0 %v3672_v12 }
 0xe05   : > { %3411 = vmatprep.subr.bf16.mxu0 %v4263_v0 }
 0xebf   : > { %v2377_v17 = vpop.f32.mrf.mxu0 }
 0xec0   : > { %v2389_v18 = vmul.f32 %v3720_v15, %v2377_v17  ;;  %v3153_v17 = vld [vmem:[%s5173_s20] ss:$0 sm:$0xff] }
 0xec1   : > { %v3393_v19 = vpop.f32.mrf.mxu0 }
 0xec2   : > { %v2394_v20 = vpack.c.bf16 %v2389_v18, %v2389_v18 }
 0xec3   : > { %v2380_v21 = vpop.f32.mrf.mxu0 }
 0xec4   : > { %3400 = vmatmul.mubr.msk.bf16.vlgmr.msra.gmra.mxu0 %vm1111_vm2, %v2394_v20 }
 0xec5   : > { %v3394_v22 = vpop.f32.mrf.mxu0  ;;  %3415 = vmatprep.mubr.msk.bf16.mxu0 %vm4264_vm0, %v4263_v0  ;;  %3412 = vmatpush3.bf16.msra.mxu0 %v2536_v38 }
 0xec6   : > { %3413 = vmatprep.subr.bf16.mxu0 %v4263_v0 }
 0xec9   : > { %3414 = vmatpush3.bf16.msra.mxu0 %v2535_v41 }
 0xeca   : > { %3427 = vmatprep.subr.bf16.mxu0 %v4263_v0 }
 0xf84   : > { %v2451_v26 = vpop.f32.mrf.mxu0 }
 0xf85   : > { %v2452_v27 = vadd.f32 %v3145_v25, %v2451_v26 }
 0xf86   : > { %v3401_v28 = vpop.f32.mrf.mxu0 }
 0xf87   : > { %vm2457_vm11 = vcmp.gt.f32.partialorder %v2452_v27, 0.0  ;;  %v2458_v29 = vmul.f32 0.01, %v2452_v27 }
 0xf88   : > { %v2454_v30 = vpop.f32.mrf.mxu0 }
 0xf89   : > { %v2459_v31 = vsel %vm2457_vm11, %v2452_v27, %v2458_v29 }
 0xf8a   : > { %v2464_v33 = vpack.c.bf16 %v2459_v31, %v2459_v31  ;;  %v3402_v34 = vpop.f32.mrf.mxu0 }
 0xf8c   : > { %3408 = vmatmul.mubr.msk.bf16.vlgmr.msra.gmra.mxu1 %vm1111_vm2, %v2464_v33 }
 0xf8d   : > { %3420 = vmatpush3.bf16.msra.mxu1 %v3675_v32  ;;  %3423 = vmatprep.mubr.msk.bf16.mxu1 %vm4264_vm0, %v4263_v0 }
 0xf8e   : > { %3421 = vmatprep.subr.bf16.mxu1 %v4263_v0 }
 0xf91   : > { %3422 = vmatpush3.bf16.msra.mxu1 %v3676_v35 }
 0xf92   : > { %3435 = vmatprep.subr.bf16.mxu1 %v4263_v0 }
 0xf94   : > { %3424 = vmatmul.mubr.msk.bf16.vlgmr.msra.gmra.mxu1 %vm1111_vm2, %v2394_v20  ;;  %v3175_v20 = vld [vmem:[%s5173_s20 + $0x1] ss:$0 sm:$0xff] }
 0xf95   : > { %3439 = vmatprep.mubr.msk.bf16.mxu1 %vm4264_vm0, %v4263_v0  ;;  %3436 = vmatpush3.bf16.msra.mxu1 %v2734_v1 }
 0xf96   : > { %3437 = vmatprep.subr.bf16.mxu1 %v4263_v0 }
 0xf99   : > { %3438 = vmatpush3.bf16.msra.mxu1 %v2733_v55 }
0x104c   : > { %v2521_v43 = vpop.f32.mrf.mxu1 }
0x104d   : > { %v2522_v44 = vadd.f32 %v3149_v42, %v2521_v43 }
0x104e   : > { %v3409_v45 = vpop.f32.mrf.mxu1 }
0x104f   : > { %vm2527_vm12 = vcmp.gt.f32.partialorder %v2522_v44, 0.0  ;;  %v2528_v48 = vmul.f32 0.01, %v2522_v44 }
0x1050   : > { %v2524_v49 = vpop.f32.mrf.mxu1 }
0x1051   : > { %v2529_v50 = vsel %vm2527_vm12, %v2522_v44, %v2528_v48 }
0x1052   : > { %v2534_v52 = vpack.c.bf16 %v2529_v50, %v2529_v50  ;;  %v3410_v53 = vpop.f32.mrf.mxu1 }
0x1054   : > { %3416 = vmatmul.mubr.msk.bf16.vlgmr.msra.gmra.mxu0 %vm1111_vm2, %v2534_v52  ;;  %v2646_v56 = vpop.f32.mrf.mxu1 }
0x1055   : > { %v2647_v57 = vadd.f32 %v3160_v54, %v2646_v56  ;;  %3428 = vmatpush3.bf16.msra.mxu0 %v3677_v51  ;;  %3431 = vmatprep.mubr.msk.bf16.mxu0 %vm4264_vm0, %v4263_v0 }
0x1056   : > { %v3425_v60 = vpop.f32.mrf.mxu1  ;;  %3429 = vmatprep.subr.bf16.mxu0 %v4263_v0 }
0x1057   : > { %vm2652_vm13 = vcmp.gt.f32.partialorder %v2647_v57, 0.0  ;;  %v2653_v61 = vmul.f32 0.01, %v2647_v57 }
0x1058   : > { %v2649_v62 = vpop.f32.mrf.mxu1 }
0x1059   : > { %v2654_v46 = vsel %vm2652_vm13, %v2647_v57, %v2653_v61  ;;  %3430 = vmatpush3.bf16.msra.mxu0 %v3678_v58 }
0x105a   : > { %v2660_v63 = vpack.c.bf16 %v2654_v46, %v2654_v46  ;;  %v3426_v3 = vpop.f32.mrf.mxu1 }
0x105c   : > { %3432 = vmatmul.mubr.msk.bf16.vlgmr.msra.gmra.mxu0 %vm1111_vm2, %v2660_v63 }
0x1114   : > { %v2581_v5 = vpop.f32.mrf.mxu0 }
0x1115   : > { %v2582_v18 = vadd.f32 %v3153_v17, %v2581_v5 }
0x1116   : > { %v3417_v16 = vpop.f32.mrf.mxu0 }
0x1118   : > { %v2584_v6 = vpop.f32.mrf.mxu0 }
0x111a   : > { %v3418_v7 = vpop.f32.mrf.mxu0 }
0x111c   : > { %v2718_v0 = vpop.f32.mrf.mxu0 }
0x111d   : > { %v2719_v9 = vadd.f32 %v3165_v8, %v2718_v0 }
0x111e   : > { %v3433_v10 = vpop.f32.mrf.mxu0 }
0x111f   : > { %vm2724_vm14 = vcmp.gt.f32.partialorder %v2719_v9, 0.0  ;;  %v2725_v11 = vmul.f32 0.01, %v2719_v9 }
0x1120   : > { %v2721_v12 = vpop.f32.mrf.mxu0 }
0x1121   : > { %v2726_v13 = vsel %vm2724_vm14, %v2719_v9, %v2725_v11 }
0x1122   : > { %v2732_v14 = vpack.c.bf16 %v2726_v13, %v2726_v13  ;;  %v3434_v15 = vpop.f32.mrf.mxu0 }
0x1124   : > { %3440 = vmatmul.mubr.msk.bf16.vlgmr.msra.gmra.mxu1 %vm1111_vm2, %v2732_v14 }
0x11e4   : > { %v2772_v19 = vpop.f32.mrf.mxu1 }
0x11e5   : > { %v2778_v21 = vadd.f32 %v2772_v19, %v2582_v18 }
0x11e6   : > { %v3441_v22 = vpop.f32.mrf.mxu1 }
0x11e7   : > { %v2787_v23 = vadd.f32 %v3175_v20, %v2778_v21 }
0x11e8   : > { %v2775_v24 = vpop.f32.mrf.mxu1 }
0x11e9   : > { %2789 = vst.msk [vmem:[%s1010_s0] sm:$0x3] %vm2788_vm15, %v2787_v23 }
0x11ea   : > { %v3442_v25 = vpop.f32.mrf.mxu1 }
0x11eb   : > { %4154 = shalt.err (!%p4151_p6)
}
0x11ec   : > { %s4155_s13 = scalar_lea.hbm %s5016_s8, 32  ;;  %s4159_s23 = scalar_lea.hbm %s5174_s12, 64 }
0x11ed   : > { %p4156_p12 = scmp.ne.s32.totalorder %s5016_s8, %s4155_s13  ;;  %p4160_p3 = scmp.lt.s32.totalorder %s5016_s8, %s5174_s12 }
0x11ee   : > { %p4161_p1 = scmp.lt.s32.totalorder %s4159_s23, %s4155_s13 }
0x11ef   : > { %p4157_p4 = pnand %p4156_p12, %p5175_p10 }
0x11f0   : > { %p4162_p2 = por %p4161_p1, %p4160_p3 }
0x11f1   : > { %p4158_p13 = pneg %p4157_p4 }
0x11f3   : > { %p4163_p5 = pnand %p4162_p2, %p4158_p13 }
0x11f5   : > { %4166 = shalt.err (!%p4163_p5)
}
0x11f6   : > { %3503 = dma.vmem_to_hbm [thread:$0]  (%p5175_p10), %s5018_s6, 32, %s5016_s8, %s2791_s29  }
0x11f7 PF: > { %s2816_s0 = sand.u32 1, %s4229_s5   ;;  %p5176_p9 = scmp.ne.s32.totalorder %s5143_s30, 0 }
0x11f8   : > { %p5177_p11 = scmp.ge.s32.totalorder %s4241_s28, 2  ;;  %s2817_s22 = scalar_lea.sflag [#allocation5], %s2816_s0 }
0x11fa   : > { %p3556_p7 = pnand %p5177_p11, %p5176_p9 }
0x11fc   : > { %p3557_p0 = pneg %p3556_p7 }
0x11fe   : > { %4224 = dma.done.wait (%p3557_p0), %s2817_s22, 32  }
0x11ff   : > { %4226 = vsyncadd (%p3557_p0), %s2817_s22, 4294967264  ;;  %s5178_s19 = sld [smem:[#allocation41_spill]]  ;;  %p47_p8 = scmp.ge.s32.totalorder %s4572_s4, 4  }
0x1200   : > { %s5179_s5 = smov %s4233_s26  ;;  %s5180_s26 = smov %s4237_s27 }
0x1201   : > { %s5182_s28 = smov %s4572_s4  ;;  %49 = sbr.rel (!%p47_p8) target bundleno = 38 (0x26), region = 244 }
0x1205   : > { %s5181_s27 = smov %s5178_s19 }
0x1206   :  { %2822 = vsyncpa [#allocation4], 1 }
0x1207   :  { %2824 = vsyncpa [#allocation4 + $0x1], 1 }
0x1208   :  { %2825 = vsyncpa [#allocation7], 1 }
0x1209   :  { %2827 = vsyncpa [#allocation7 + $0x1], 1 }
0x120a   :  { %2828 = vsyncpa [#allocation10], 1 }
0x120b   :  { %2829 = vsyncpa [#allocation13], 1 }
0x120c   :  { %2830 = vsyncpa [#allocation16], 1 }
0x120d   :  { %2831 = vsyncpa [#allocation19], 1 }
0x120e   :  { %2832 = vsyncpa [#allocation22], 1 }
0x120f   :  { %2833 = vsyncpa [#allocation25], 1 }
0x1210   :  { %2834 = vsyncpa [#allocation28], 1 }
0x1211   :  { %2835 = vsyncpa [#allocation5], 1 }
0x1212   :  { %2837 = vsyncpa [#allocation5 + $0x1], 1 }

</bundles_post_ra>
